<compile_context>
chip_gen: v6e
topology: v6e:2x2x1
jax: 0.10.0
libtpu: 0.0.40
codegen_flags: <defaults>
</compile_context>

<pallas_src>
import jax
import jax.numpy as jnp
from jax.experimental import pallas as pl
from jax.experimental.pallas import tpu as pltpu

_HIDDEN = (512, 256, 128, 64, 32)


def _mlp_kernel(x_ref,
                w1, b1, w2, b2, w3, b3, w4, b4, w5, b5, w6, b6,
                o_ref):
    # Whole forward pass fused per batch tile: 5 MXU matmuls + bias + ReLU, VPU final layer + sigmoid.
    def dense_relu(h, w_ref, b_ref):
        z = jnp.dot(h.astype(jnp.bfloat16), w_ref[...],
                    preferred_element_type=jnp.float32) + b_ref[...]
        return jnp.maximum(z, 0.0)

    h = x_ref[...]                       # (TB, in) f32 tile (already f32 -> no redundant cast pass)
    h = dense_relu(h, w1, b1)            # (TB, 512)   Dropout -> identity (eval)
    h = dense_relu(h, w2, b2)            # (TB, 256)
    h = dense_relu(h, w3, b3)            # (TB, 128)
    h = dense_relu(h, w4, b4)            # (TB, 64)
    h = dense_relu(h, w5, b5)            # (TB, 32)
    # Final 32 -> 1 projection on VPU + XLU: a (TB,32)@(32,1) MXU matmul would waste 127/128 lanes.
    logits = jnp.sum(h * w6[...], axis=-1, keepdims=True) + b6[...]   # (TB, 1) f32
    o_ref[...] = jax.nn.sigmoid(logits).astype(o_ref.dtype)


def deeper_nn_forward(x, params, *, tb=128):
    """x: (B, in_dim) float32.
    params: [(W1,b1)..(W5,b5),(w6_row,b6)]; W_l stored (in, out) bf16, biases (1, out) f32,
    last-layer weight stored as a (1, 32) row (consumed on the VPU, not the MXU)."""
    assert tb % 8 == 0, "batch tile must be a multiple of 8 (TPU sublane)"
    B, in_dim = x.shape
    G = pl.cdiv(B, tb)
    B_pad = G * tb
    if B_pad != B:
        x = jnp.pad(x, ((0, B_pad - B), (0, 0)))

    flat = [t for wb in params for t in wb]

    def resident_spec(shape):
        # Full-array block + constant index -> DMA'd once, stays VMEM-resident across grid steps.
        return pl.BlockSpec(shape, lambda *_: (0,) * len(shape))

    in_specs = [pl.BlockSpec((tb, in_dim), lambda i: (i, 0))]
    in_specs += [resident_spec(t.shape) for t in flat]

    dims = (in_dim,) + _HIDDEN + (1,)
    flops = 2 * B_pad * sum(a * b for a, b in zip(dims[:-1], dims[1:]))
    param_bytes = sum(int(t.size) * t.dtype.itemsize for t in flat)
    cost = pl.CostEstimate(
        flops=int(flops),
        transcendentals=int(B_pad),                      # one exp per sigmoid output
        bytes_accessed=int(B_pad * in_dim * 4 + param_bytes + B_pad * 4),
    )

    out = pl.pallas_call(
        _mlp_kernel,
        out_shape=jax.ShapeDtypeStruct((B_pad, 1), jnp.float32),
        grid=(G,),
        in_specs=in_specs,
        out_specs=pl.BlockSpec((tb, 1), lambda i: (i, 0)),
        compiler_params=pltpu.CompilerParams(
            dimension_semantics=("parallel",),           # batch tiles shard across v7x's 2 TCs
        ),
        cost_estimate=cost,
    )(x, *flat)
    return out[:B]


def init_params(input_shape, key):
    """Deterministic init matching DeeperNN.__init__ layer shapes (PyTorch-style uniform bounds).
    Weights stored (in, out) bf16; biases (1, out) f32; last weight stored as a (1, 32) row."""
    dims = (input_shape,) + _HIDDEN + (1,)
    params = []
    for i in range(len(dims) - 1):
        key, wk, bk = jax.random.split(key, 3)
        bound = 1.0 / float(dims[i]) ** 0.5
        w = jax.random.uniform(wk, (dims[i], dims[i + 1]), jnp.float32, -bound, bound)
        b = jax.random.uniform(bk, (1, dims[i + 1]), jnp.float32, -bound, bound)
        if i == len(dims) - 2:
            w = w.T                                      # (1, 32) row for the VPU final projection
        params.append((w.astype(jnp.bfloat16), b))
    return params


def reference_forward(x, params):
    """Pure-JAX reference with the same bf16-weight / f32-accumulate numerics as the kernel."""
    h = x
    for w, b in params[:-1]:
        z = jnp.dot(h.astype(jnp.bfloat16), w, preferred_element_type=jnp.float32) + b
        h = jnp.maximum(z, 0.0)
    w6, b6 = params[-1]
    logits = jnp.sum(h * w6, axis=-1, keepdims=True) + b6
    return jax.nn.sigmoid(logits)


if __name__ == "__main__":
    key = jax.random.PRNGKey(0)
    key, xk = jax.random.split(key)

    # Small but MXU-meaningful: 300 rows exercises multi-tile grid + remainder padding at TB=128.
    batch, input_shape = 300, 64
    x = jax.random.normal(xk, (batch, input_shape), jnp.float32)
    params = init_params(input_shape, key)

    out = jax.block_until_ready(deeper_nn_forward(x, params, tb=128))
    ref = reference_forward(x, params)

    assert out.shape == (batch, 1)
    assert jnp.allclose(out, ref, atol=1e-3, rtol=1e-3), "mismatch vs pure-JAX reference"

    print("KERNEL_OK")
</pallas_src>

<mosaic_0001>
module attributes {stable_mosaic.version = 11 : i64} {
  func.func @_mlp_kernel(%arg0: i32, %arg1: memref<128x64xf32, #tpu.memory_space<vmem>>, %arg2: memref<64x512xbf16, #tpu.memory_space<vmem>>, %arg3: memref<1x512xf32, #tpu.memory_space<vmem>>, %arg4: memref<512x256xbf16, #tpu.memory_space<vmem>>, %arg5: memref<1x256xf32, #tpu.memory_space<vmem>>, %arg6: memref<256x128xbf16, #tpu.memory_space<vmem>>, %arg7: memref<1x128xf32, #tpu.memory_space<vmem>>, %arg8: memref<128x64xbf16, #tpu.memory_space<vmem>>, %arg9: memref<1x64xf32, #tpu.memory_space<vmem>>, %arg10: memref<64x32xbf16, #tpu.memory_space<vmem>>, %arg11: memref<1x32xf32, #tpu.memory_space<vmem>>, %arg12: memref<1x32xbf16, #tpu.memory_space<vmem>>, %arg13: memref<1x1xf32, #tpu.memory_space<vmem>>, %arg14: memref<128x1xf32, #tpu.memory_space<vmem>>) attributes {dimension_semantics = [#tpu.dimension_semantics<parallel>], iteration_bounds = array<i64: 3>, scalar_prefetch = 0 : i64, scratch_operands = 0 : i64, tpu.core_type = #tpu.core_type<tc>, window_params = [{transform_indices = @transform_0, window_bounds = array<i64: 128, 64>}, {pipeline_mode = #tpu.pipeline_mode<synchronous>, transform_indices = @transform_1, window_bounds = array<i64: 64, 512>}, {pipeline_mode = #tpu.pipeline_mode<synchronous>, transform_indices = @transform_2, window_bounds = array<i64: 1, 512>}, {pipeline_mode = #tpu.pipeline_mode<synchronous>, transform_indices = @transform_3, window_bounds = array<i64: 512, 256>}, {pipeline_mode = #tpu.pipeline_mode<synchronous>, transform_indices = @transform_4, window_bounds = array<i64: 1, 256>}, {pipeline_mode = #tpu.pipeline_mode<synchronous>, transform_indices = @transform_5, window_bounds = array<i64: 256, 128>}, {pipeline_mode = #tpu.pipeline_mode<synchronous>, transform_indices = @transform_6, window_bounds = array<i64: 1, 128>}, {pipeline_mode = #tpu.pipeline_mode<synchronous>, transform_indices = @transform_7, window_bounds = array<i64: 128, 64>}, {pipeline_mode = #tpu.pipeline_mode<synchronous>, transform_indices = @transform_8, window_bounds = array<i64: 1, 64>}, {pipeline_mode = #tpu.pipeline_mode<synchronous>, transform_indices = @transform_9, window_bounds = array<i64: 64, 32>}, {pipeline_mode = #tpu.pipeline_mode<synchronous>, transform_indices = @transform_10, window_bounds = array<i64: 1, 32>}, {pipeline_mode = #tpu.pipeline_mode<synchronous>, transform_indices = @transform_11, window_bounds = array<i64: 1, 32>}, {pipeline_mode = #tpu.pipeline_mode<synchronous>, transform_indices = @transform_12, window_bounds = array<i64: 1, 1>}, {transform_indices = @transform_13, window_bounds = array<i64: 128, 1>}]} {
    %c0 = arith.constant 0 : index
    %c0_0 = arith.constant 0 : index
    %0 = vector.load %arg1[%c0, %c0_0] : memref<128x64xf32, #tpu.memory_space<vmem>>, vector<128x64xf32>
    %1 = arith.truncf %0 : vector<128x64xf32> to vector<128x64xbf16>
    %c0_1 = arith.constant 0 : index
    %c0_2 = arith.constant 0 : index
    %2 = vector.load %arg2[%c0_1, %c0_2] : memref<64x512xbf16, #tpu.memory_space<vmem>>, vector<64x512xbf16>
    %cst = arith.constant dense<0.000000e+00> : vector<128x512xf32>
    %3 = tpu.matmul %1, %2, %cst {dimension_numbers = #tpu.dot_dimension_numbers<[1], [0], [0], [1], [0, 0, 1, 1], [], []>} : vector<128x64xbf16>, vector<64x512xbf16>, vector<128x512xf32> -> vector<128x512xf32>
    %c0_3 = arith.constant 0 : index
    %c0_4 = arith.constant 0 : index
    %4 = vector.load %arg3[%c0_3, %c0_4] : memref<1x512xf32, #tpu.memory_space<vmem>>, vector<1x512xf32>
    %5 = vector.broadcast %4 : vector<1x512xf32> to vector<128x512xf32>
    %6 = arith.addf %3, %5 : vector<128x512xf32>
    %cst_5 = arith.constant 0.000000e+00 : f32
    %7 = vector.broadcast %cst_5 : f32 to vector<128x512xf32>
    %8 = arith.maximumf %6, %7 : vector<128x512xf32>
    %9 = arith.truncf %8 : vector<128x512xf32> to vector<128x512xbf16>
    %c0_6 = arith.constant 0 : index
    %c0_7 = arith.constant 0 : index
    %10 = vector.load %arg4[%c0_6, %c0_7] : memref<512x256xbf16, #tpu.memory_space<vmem>>, vector<512x256xbf16>
    %cst_8 = arith.constant dense<0.000000e+00> : vector<128x256xf32>
    %11 = tpu.matmul %9, %10, %cst_8 {dimension_numbers = #tpu.dot_dimension_numbers<[1], [0], [0], [1], [0, 0, 1, 1], [], []>} : vector<128x512xbf16>, vector<512x256xbf16>, vector<128x256xf32> -> vector<128x256xf32>
    %c0_9 = arith.constant 0 : index
    %c0_10 = arith.constant 0 : index
    %12 = vector.load %arg5[%c0_9, %c0_10] : memref<1x256xf32, #tpu.memory_space<vmem>>, vector<1x256xf32>
    %13 = vector.broadcast %12 : vector<1x256xf32> to vector<128x256xf32>
    %14 = arith.addf %11, %13 : vector<128x256xf32>
    %cst_11 = arith.constant 0.000000e+00 : f32
    %15 = vector.broadcast %cst_11 : f32 to vector<128x256xf32>
    %16 = arith.maximumf %14, %15 : vector<128x256xf32>
    %17 = arith.truncf %16 : vector<128x256xf32> to vector<128x256xbf16>
    %c0_12 = arith.constant 0 : index
    %c0_13 = arith.constant 0 : index
    %18 = vector.load %arg6[%c0_12, %c0_13] : memref<256x128xbf16, #tpu.memory_space<vmem>>, vector<256x128xbf16>
    %cst_14 = arith.constant dense<0.000000e+00> : vector<128x128xf32>
    %19 = tpu.matmul %17, %18, %cst_14 {dimension_numbers = #tpu.dot_dimension_numbers<[1], [0], [0], [1], [0, 0, 1, 1], [], []>} : vector<128x256xbf16>, vector<256x128xbf16>, vector<128x128xf32> -> vector<128x128xf32>
    %c0_15 = arith.constant 0 : index
    %c0_16 = arith.constant 0 : index
    %20 = vector.load %arg7[%c0_15, %c0_16] : memref<1x128xf32, #tpu.memory_space<vmem>>, vector<1x128xf32>
    %21 = vector.broadcast %20 : vector<1x128xf32> to vector<128x128xf32>
    %22 = arith.addf %19, %21 : vector<128x128xf32>
    %cst_17 = arith.constant 0.000000e+00 : f32
    %23 = vector.broadcast %cst_17 : f32 to vector<128x128xf32>
    %24 = arith.maximumf %22, %23 : vector<128x128xf32>
    %25 = arith.truncf %24 : vector<128x128xf32> to vector<128x128xbf16>
    %c0_18 = arith.constant 0 : index
    %c0_19 = arith.constant 0 : index
    %26 = vector.load %arg8[%c0_18, %c0_19] : memref<128x64xbf16, #tpu.memory_space<vmem>>, vector<128x64xbf16>
    %cst_20 = arith.constant dense<0.000000e+00> : vector<128x64xf32>
    %27 = tpu.matmul %25, %26, %cst_20 {dimension_numbers = #tpu.dot_dimension_numbers<[1], [0], [0], [1], [0, 0, 1, 1], [], []>} : vector<128x128xbf16>, vector<128x64xbf16>, vector<128x64xf32> -> vector<128x64xf32>
    %c0_21 = arith.constant 0 : index
    %c0_22 = arith.constant 0 : index
    %28 = vector.load %arg9[%c0_21, %c0_22] : memref<1x64xf32, #tpu.memory_space<vmem>>, vector<1x64xf32>
    %29 = vector.broadcast %28 : vector<1x64xf32> to vector<128x64xf32>
    %30 = arith.addf %27, %29 : vector<128x64xf32>
    %cst_23 = arith.constant 0.000000e+00 : f32
    %31 = vector.broadcast %cst_23 : f32 to vector<128x64xf32>
    %32 = arith.maximumf %30, %31 : vector<128x64xf32>
    %33 = arith.truncf %32 : vector<128x64xf32> to vector<128x64xbf16>
    %c0_24 = arith.constant 0 : index
    %c0_25 = arith.constant 0 : index
    %34 = vector.load %arg10[%c0_24, %c0_25] : memref<64x32xbf16, #tpu.memory_space<vmem>>, vector<64x32xbf16>
    %cst_26 = arith.constant dense<0.000000e+00> : vector<128x32xf32>
    %35 = tpu.matmul %33, %34, %cst_26 {dimension_numbers = #tpu.dot_dimension_numbers<[1], [0], [0], [1], [0, 0, 1, 1], [], []>} : vector<128x64xbf16>, vector<64x32xbf16>, vector<128x32xf32> -> vector<128x32xf32>
    %c0_27 = arith.constant 0 : index
    %c0_28 = arith.constant 0 : index
    %36 = vector.load %arg11[%c0_27, %c0_28] : memref<1x32xf32, #tpu.memory_space<vmem>>, vector<1x32xf32>
    %37 = vector.broadcast %36 : vector<1x32xf32> to vector<128x32xf32>
    %38 = arith.addf %35, %37 : vector<128x32xf32>
    %cst_29 = arith.constant 0.000000e+00 : f32
    %39 = vector.broadcast %cst_29 : f32 to vector<128x32xf32>
    %40 = arith.maximumf %38, %39 : vector<128x32xf32>
    %c0_30 = arith.constant 0 : index
    %c0_31 = arith.constant 0 : index
    %41 = vector.load %arg12[%c0_30, %c0_31] : memref<1x32xbf16, #tpu.memory_space<vmem>>, vector<1x32xbf16>
    %42 = arith.extf %41 : vector<1x32xbf16> to vector<1x32xf32>
    %43 = vector.broadcast %42 : vector<1x32xf32> to vector<128x32xf32>
    %44 = arith.mulf %40, %43 : vector<128x32xf32>
    %cst_32 = arith.constant dense<0.000000e+00> : vector<128xf32>
    %45 = vector.multi_reduction <add>, %44, %cst_32 [1] : vector<128x32xf32> to vector<128xf32>
    %46 = vector.shape_cast %45 : vector<128xf32> to vector<128x1xf32>
    %c0_33 = arith.constant 0 : index
    %c0_34 = arith.constant 0 : index
    %47 = vector.load %arg13[%c0_33, %c0_34] : memref<1x1xf32, #tpu.memory_space<vmem>>, vector<1x1xf32>
    %48 = vector.broadcast %47 : vector<1x1xf32> to vector<128x1xf32>
    %49 = arith.addf %46, %48 : vector<128x1xf32>
    %50 = arith.negf %49 : vector<128x1xf32>
    %51 = math.exp %50 : vector<128x1xf32>
    %cst_35 = arith.constant 1.000000e+00 : f32
    %52 = vector.broadcast %cst_35 : f32 to vector<128x1xf32>
    %53 = arith.addf %52, %51 : vector<128x1xf32>
    %54 = arith.divf %52, %53 : vector<128x1xf32>
    %c0_36 = arith.constant 0 : index
    %c0_37 = arith.constant 0 : index
    %55 = vector.load %arg14[%c0_36, %c0_37] : memref<128x1xf32, #tpu.memory_space<vmem>>, vector<128x1xf32>
    tpu.vector_store %arg14[%c0_36, %c0_37], %54 {strides = array<i32>} : memref<128x1xf32, #tpu.memory_space<vmem>>, vector<128x1xf32>,
    return
  }
  func.func @transform_0(%arg0: i32) -> (i32, i32) {
    %c0_i32 = arith.constant 0 : i32
    %c0_i32_0 = arith.constant 0 : i32
    return %arg0, %c0_i32 : i32, i32
  }
  func.func @transform_1(%arg0: i32) -> (i32, i32) {
    %c0_i32 = arith.constant 0 : i32
    %c0_i32_0 = arith.constant 0 : i32
    %c0_i32_1 = arith.constant 0 : i32
    return %c0_i32, %c0_i32_0 : i32, i32
  }
  func.func @transform_2(%arg0: i32) -> (i32, i32) {
    %c0_i32 = arith.constant 0 : i32
    %c0_i32_0 = arith.constant 0 : i32
    %c0_i32_1 = arith.constant 0 : i32
    return %c0_i32, %c0_i32_0 : i32, i32
  }
  func.func @transform_3(%arg0: i32) -> (i32, i32) {
    %c0_i32 = arith.constant 0 : i32
    %c0_i32_0 = arith.constant 0 : i32
    %c0_i32_1 = arith.constant 0 : i32
    return %c0_i32, %c0_i32_0 : i32, i32
  }
  func.func @transform_4(%arg0: i32) -> (i32, i32) {
    %c0_i32 = arith.constant 0 : i32
    %c0_i32_0 = arith.constant 0 : i32
    %c0_i32_1 = arith.constant 0 : i32
    return %c0_i32, %c0_i32_0 : i32, i32
  }
  func.func @transform_5(%arg0: i32) -> (i32, i32) {
    %c0_i32 = arith.constant 0 : i32
    %c0_i32_0 = arith.constant 0 : i32
    %c0_i32_1 = arith.constant 0 : i32
    return %c0_i32, %c0_i32_0 : i32, i32
  }
  func.func @transform_6(%arg0: i32) -> (i32, i32) {
    %c0_i32 = arith.constant 0 : i32
    %c0_i32_0 = arith.constant 0 : i32
    %c0_i32_1 = arith.constant 0 : i32
    return %c0_i32, %c0_i32_0 : i32, i32
  }
  func.func @transform_7(%arg0: i32) -> (i32, i32) {
    %c0_i32 = arith.constant 0 : i32
    %c0_i32_0 = arith.constant 0 : i32
    %c0_i32_1 = arith.constant 0 : i32
    return %c0_i32, %c0_i32_0 : i32, i32
  }
  func.func @transform_8(%arg0: i32) -> (i32, i32) {
    %c0_i32 = arith.constant 0 : i32
    %c0_i32_0 = arith.constant 0 : i32
    %c0_i32_1 = arith.constant 0 : i32
    return %c0_i32, %c0_i32_0 : i32, i32
  }
  func.func @transform_9(%arg0: i32) -> (i32, i32) {
    %c0_i32 = arith.constant 0 : i32
    %c0_i32_0 = arith.constant 0 : i32
    %c0_i32_1 = arith.constant 0 : i32
    return %c0_i32, %c0_i32_0 : i32, i32
  }
  func.func @transform_10(%arg0: i32) -> (i32, i32) {
    %c0_i32 = arith.constant 0 : i32
    %c0_i32_0 = arith.constant 0 : i32
    %c0_i32_1 = arith.constant 0 : i32
    return %c0_i32, %c0_i32_0 : i32, i32
  }
  func.func @transform_11(%arg0: i32) -> (i32, i32) {
    %c0_i32 = arith.constant 0 : i32
    %c0_i32_0 = arith.constant 0 : i32
    %c0_i32_1 = arith.constant 0 : i32
    return %c0_i32, %c0_i32_0 : i32, i32
  }
  func.func @transform_12(%arg0: i32) -> (i32, i32) {
    %c0_i32 = arith.constant 0 : i32
    %c0_i32_0 = arith.constant 0 : i32
    %c0_i32_1 = arith.constant 0 : i32
    return %c0_i32, %c0_i32_0 : i32, i32
  }
  func.func @transform_13(%arg0: i32) -> (i32, i32) {
    %c0_i32 = arith.constant 0 : i32
    %c0_i32_0 = arith.constant 0 : i32
    return %arg0, %c0_i32 : i32, i32
  }
}

</mosaic_0001>

<bundles_post_ra>
// kernel: tpu_custom_call.1
= control target key start
LH: loop header
LB: loop body
LE: loop exit
PB: predicated region body
PF: predicated region fallthrough
CT: control target
= control target key end

     0   :  { %s3824_s0 = inlined_call_operand.vmem [shape: f32[384,64], index: 0, kind: input, shape index: {}]   ;;  %s3825_s1 = inlined_call_operand.vmem [shape: bf16[64,512], index: 1, kind: input, shape index: {}]   ;;  %s3826_s2 = inlined_call_operand.vmem [shape: f32[1,512], index: 2, kind: input, shape index: {}]   ;;  %s3827_s3 = inlined_call_operand.vmem [shape: bf16[512,256], index: 3, kind: input, shape index: {}]   ;;  %s3828_s4 = inlined_call_operand.vmem [shape: f32[1,256], index: 4, kind: input, shape index: {}]   ;;  %s3829_s5 = inlined_call_operand.hbm [shape: bf16[256,128], index: 5, kind: input, shape index: {}]   ;;  %s3830_s6 = inlined_call_operand.vmem [shape: f32[1,128], index: 6, kind: input, shape index: {}]   ;;  %s3831_s7 = inlined_call_operand.vmem [shape: bf16[128,64], index: 7, kind: input, shape index: {}]   ;;  %s3832_s8 = inlined_call_operand.vmem [shape: f32[1,64], index: 8, kind: input, shape index: {}]   ;;  %s3833_s9 = inlined_call_operand.vmem [shape: bf16[64,32], index: 9, kind: input, shape index: {}]   ;;  %s3834_s10 = inlined_call_operand.vmem [shape: f32[1,32], index: 10, kind: input, shape index: {}]   ;;  %s3835_s11 = inlined_call_operand.vmem [shape: bf16[1,32], index: 11, kind: input, shape index: {}]   ;;  %s3836_s12 = inlined_call_operand.<no memory space> [shape: f32[1,1], index: 12, kind: input, shape index: {}]   ;;  %s3837_s13 = inlined_call_operand.vmem [shape: f32[384,1], index: 13, kind: output, shape index: {}]  }
   0x1   :  { %v18_v0 = vstv %s3836_s12 }
   0x2   :  { %19 = vst [vmem:[#allocation2] sm:$0x1] %v18_v0 }
   0x3   :  { %20 = vsyncpa [#allocation4], 0  ;;  %s3182_s27 = smov 0  }
   0x4 LB: > { %s2520_s28 = sadd.s32 4294967295, %s3103_s27   ;;  %p2522_p0 = scmp.ge.s32.totalorder %s3103_s27, 1  ;;  %s3103_s27 = sphi %s3182_s27, %s26_s27  }
   0x5   : > { %p335_p1 = scmp.lt.s32.totalorder %s3103_s27, 4  ;;  %s3105_s29 = smov [#allocation3]  }
   0x6   : > { %s359_s30 = sshll.u32 %s3105_s29, 4  ;;  %p3194_p3 = scmp.eq.s32.totalorder %s2520_s28, 0  ;;  %s360_s30 = int_to_ptr.vmem [resolvable:$true] %s359_s30 }
   0x7   : > { %p3190_p2 = pnand %p2522_p0, %p335_p1  ;;  %s3078_s15 = scalar_lea.vmem %s360_s30, 2048 }
   0x8   : > { %p3079_p7 = scmp.ne.s32.totalorder %s360_s30, %s3078_s15  ;;  %p3086_p10 = scmp.lt.s32.totalorder %s360_s30, %s360_s30 }
   0x9   : > { %p2837_p4 = pneg %p3190_p2  ;;  %p3087_p11 = scmp.lt.s32.totalorder %s3078_s15, %s3078_s15 }
   0xb   : > { %p2838_p5 = pnand %p3194_p3, %p2837_p4  ;;  %p3088_p12 = por %p3087_p11, %p3086_p10 }
   0xd   : > { %p3069_p6 = pneg %p2838_p5 }
   0xf   : > { %p3081_p8 = pnand %p3079_p7, %p3069_p6 }
  0x11   : > { %p3082_p9 = pneg %p3081_p8 }
  0x13   : > { %p3089_p13 = pnand %p3088_p12, %p3082_p9 }
  0x15   : > { %3092 = shalt.err (!%p3089_p13)
}
  0x16   : > { %s3106_s16 = smov 64   ;;  %s3107_s17 = smov 4  }
  0x17   : > { %2840 = dma.hbm_to_vmem [thread:$0]  (!%p2838_p5), %s3829_s5, 2048, %s360_s30, [#allocation4], %s3106_s16, %s3106_s16, %s3107_s17  }
  0x18   : > { %405 = sbr.rel (%p3190_p2) target bundleno = 1314 (0x522), region = 72 }
  0x1d   : > { %3098 = dma.done.wait (%p3194_p3), [#allocation4], 2048  }
  0x1e   : > { %3100 = vsyncadd (%p3194_p3), [#allocation4], 4294965248  ;;  %v3108_v1 = vmov 0   ;;  %s2527_s20 = sshll.u32 %s2520_s28, 4  ;;  %v2855_v2 = vld [vmem:[%s3825_s1 + $0x64] ss:$16 sps:$4 sm:$0xff]  }
  0x1f   : > { %661 = vmatprep.mubr.bf16.mxu0 %v3108_v1  ;;  %774 = vmatprep.mubr.bf16.mxu1 %v3108_v1  ;;  %p450_p0 = scmp.lt.s32.totalorder %s2527_s20, 47  ;;  %v2857_v3 = vld [vmem:[%s3825_s1 + $0x6c] ss:$16 sps:$4 sm:$0xff]   ;;  %v2859_v4 = vld [vmem:[%s3825_s1 + $0x60] ss:$16 sps:$4 sm:$0xff]   ;;  %vm604_vm0 = vcmask 523264  }
  0x20   : > { %637 = vmatprep.subr.bf16.mxu0 %v2855_v2  ;;  %v2860_v5 = vld [vmem:[%s3825_s1 + $0x68] ss:$16 sps:$4 sm:$0xff]   ;;  %750 = vmatprep.subr.bf16.mxu1 %v2857_v3  ;;  %v2861_v6 = vld [vmem:[%s3825_s1 + $0x44] ss:$16 sps:$4 sm:$0xff]   ;;  %v2863_v7 = vld [vmem:[%s3825_s1 + $0x4c] ss:$16 sps:$4 sm:$0xff]  }
  0x21   : > { %s3841_s20 = smov (!%p450_p0, %s2527_s20), 47  ;;  %638 = vmatpush1.bf16.msra.mxu0 %v2859_v4  ;;  %751 = vmatpush1.bf16.msra.mxu1 %v2860_v5  ;;  %v2865_v8 = vld [vmem:[%s3825_s1 + $0x40] ss:$16 sps:$4 sm:$0xff]   ;;  %v2866_v9 = vld [vmem:[%s3825_s1 + $0x48] ss:$16 sps:$4 sm:$0xff]   ;;  %vm2267_vm1 = vcmask 261120  }
  0x22   : > { %639 = vmatprep.subr.bf16.mxu0 %v2861_v6  ;;  %752 = vmatprep.subr.bf16.mxu1 %v2863_v7  ;;  %v2867_v10 = vld [vmem:[%s3825_s1 + $0x24] ss:$16 sps:$4 sm:$0xff]   ;;  %s2528_s23 = sshll.u32 %s3841_s20, 3  ;;  %v2869_v11 = vld [vmem:[%s3825_s1 + $0x2c] ss:$16 sps:$4 sm:$0xff]   ;;  %vm2435_vm2 = vcmask 7168  }
  0x23   : > { %v2871_v12 = vld [vmem:[%s3825_s1 + $0x20] ss:$16 sps:$4 sm:$0xff]   ;;  %v2872_v13 = vld [vmem:[%s3825_s1 + $0x28] ss:$16 sps:$4 sm:$0xff]   ;;  %v2873_v14 = vld [vmem:[%s3825_s1 + $0x4] ss:$16 sps:$4 sm:$0xff]   ;;  %s3263_s19 = scalar_lea.vmem %s3824_s0, %s2528_s23  ;;  %s3779_s16 = scalar_lea.vmem %s3837_s13, %s2528_s23 }
  0x24   : > { %v2875_v15 = vld [vmem:[%s3825_s1 + $0xc] ss:$16 sps:$4 sm:$0xff]   ;;  %v2877_v16 = vld [vmem:[%s3825_s1] ss:$16 sps:$4 sm:$0xff]   ;;  %v2878_v17 = vld [vmem:[%s3825_s1 + $0x8] ss:$16 sps:$4 sm:$0xff]  }
  0x25   : > { %640 = vmatpush1.bf16.msra.mxu0 %v2865_v8  ;;  %753 = vmatpush1.bf16.msra.mxu1 %v2866_v9  ;;  %v462_v18 = vld [vmem:[%s3263_s19] sm:$0xff]  ;;  %v463_v19 = vld [vmem:[%s3263_s19 + $0x8] sm:$0xff]  ;;  %v2879_v21 = vld [vmem:[%s3827_s3 + $0x70] ss:$8 sps:$4 sm:$0xff]  }
  0x26   : > { %641 = vmatprep.subr.bf16.mxu0 %v2867_v10  ;;  %754 = vmatprep.subr.bf16.mxu1 %v2869_v11  ;;  %v478_v20 = vpack.c.bf16 %v463_v19, %v462_v18  ;;  %v2881_v22 = vld [vmem:[%s3827_s3 + $0x74] ss:$8 sps:$4 sm:$0xff]   ;;  %v2882_v23 = vld [vmem:[%s3827_s3 + $0x170] ss:$8 sps:$4 sm:$0xff]   ;;  %v2887_v26 = vld [vmem:[%s3827_s3 + $0x64] ss:$8 sps:$4 sm:$0xff]  }
  0x27   : > { %v2884_v24 = vld [vmem:[%s3827_s3 + $0x174] ss:$8 sps:$4 sm:$0xff]   ;;  %v2890_v28 = vld [vmem:[%s3827_s3 + $0x164] ss:$8 sps:$4 sm:$0xff]   ;;  %v2885_v29 = vld [vmem:[%s3827_s3 + $0x60] ss:$8 sps:$4 sm:$0xff]  }
  0x28   : > { %v464_v25 = vld [vmem:[%s3263_s19 + $0x10] sm:$0xff]  ;;  %v465_v27 = vld [vmem:[%s3263_s19 + $0x18] sm:$0xff]  ;;  %v2888_v30 = vld [vmem:[%s3827_s3 + $0x160] ss:$8 sps:$4 sm:$0xff]  }
  0x29   : > { %642 = vmatpush1.bf16.msra.mxu0 %v2871_v12  ;;  %755 = vmatpush1.bf16.msra.mxu1 %v2872_v13  ;;  %v479_v31 = vpack.c.bf16 %v465_v27, %v464_v25  ;;  %v2893_v32 = vld [vmem:[%s3827_s3 + $0x54] ss:$8 sps:$4 sm:$0xff]   ;;  %v466_v34 = vld [vmem:[%s3263_s19 + $0x20] sm:$0xff]  ;;  %v2891_v35 = vld [vmem:[%s3827_s3 + $0x50] ss:$8 sps:$4 sm:$0xff]  }
  0x2a   : > { %643 = vmatprep.subr.bf16.mxu0 %v2873_v14  ;;  %756 = vmatprep.subr.bf16.mxu1 %v2875_v15  ;;  %v2896_v33 = vld [vmem:[%s3827_s3 + $0x154] ss:$8 sps:$4 sm:$0xff]   ;;  %v2894_v36 = vld [vmem:[%s3827_s3 + $0x150] ss:$8 sps:$4 sm:$0xff]   ;;  %v2899_v37 = vld [vmem:[%s3827_s3 + $0x44] ss:$8 sps:$4 sm:$0xff]  }
  0x2b   : > { %v2902_v38 = vld [vmem:[%s3827_s3 + $0x144] ss:$8 sps:$4 sm:$0xff]   ;;  %v2897_v40 = vld [vmem:[%s3827_s3 + $0x40] ss:$8 sps:$4 sm:$0xff]   ;;  %v2905_v43 = vld [vmem:[%s3827_s3 + $0x34] ss:$8 sps:$4 sm:$0xff]  }
  0x2c   : > { %v467_v39 = vld [vmem:[%s3263_s19 + $0x28] sm:$0xff]  ;;  %v2908_v44 = vld [vmem:[%s3827_s3 + $0x134] ss:$8 sps:$4 sm:$0xff]   ;;  %v2903_v46 = vld [vmem:[%s3827_s3 + $0x30] ss:$8 sps:$4 sm:$0xff]  }
  0x2d   : > { %644 = vmatpush1.bf16.msra.mxu0 %v2877_v16  ;;  %757 = vmatpush1.bf16.msra.mxu1 %v2878_v17  ;;  %v2900_v41 = vld [vmem:[%s3827_s3 + $0x140] ss:$8 sps:$4 sm:$0xff]   ;;  %v480_v42 = vpack.c.bf16 %v467_v39, %v466_v34  ;;  %v468_v45 = vld [vmem:[%s3263_s19 + $0x30] sm:$0xff]  ;;  %v2911_v48 = vld [vmem:[%s3827_s3 + $0x24] ss:$8 sps:$4 sm:$0xff]  }
  0x2e   : > { %1347 = vmatprep.subr.bf16.mxu0 %v2881_v22  ;;  %1460 = vmatprep.subr.bf16.mxu1 %v2884_v24  ;;  %v2906_v47 = vld [vmem:[%s3827_s3 + $0x130] ss:$8 sps:$4 sm:$0xff]   ;;  %v2914_v49 = vld [vmem:[%s3827_s3 + $0x124] ss:$8 sps:$4 sm:$0xff]   ;;  %v2909_v51 = vld [vmem:[%s3827_s3 + $0x20] ss:$8 sps:$4 sm:$0xff]  }
  0x2f   : > { %v469_v50 = vld [vmem:[%s3263_s19 + $0x38] sm:$0xff]  ;;  %v2912_v52 = vld [vmem:[%s3827_s3 + $0x120] ss:$8 sps:$4 sm:$0xff]   ;;  %v2923_v59 = vld [vmem:[%s3827_s3 + $0x4] ss:$8 sps:$4 sm:$0xff]  }
  0x30   : > { %2547 = vmatmul.mubr.msk.bf16.vlgmr.msra.gmra.mxu0 %vm604_vm0, %v478_v20  ;;  %2555 = vmatmul.mubr.msk.bf16.vlgmr.msra.gmra.mxu1 %vm604_vm0, %v478_v20  ;;  %v481_v53 = vpack.c.bf16 %v469_v50, %v468_v45  ;;  %v2917_v54 = vld [vmem:[%s3827_s3 + $0x14] ss:$8 sps:$4 sm:$0xff]   ;;  %v470_v56 = vld [vmem:[%s3263_s19 + $0x40] sm:$0xff]  ;;  %v2915_v57 = vld [vmem:[%s3827_s3 + $0x10] ss:$8 sps:$4 sm:$0xff]  }
  0x31   : > { %671 = vmatprep.mubr.bf16.mxu0 %v3108_v1  ;;  %784 = vmatprep.mubr.bf16.mxu1 %v3108_v1  ;;  %v2920_v55 = vld [vmem:[%s3827_s3 + $0x114] ss:$8 sps:$4 sm:$0xff]   ;;  %v2918_v58 = vld [vmem:[%s3827_s3 + $0x110] ss:$8 sps:$4 sm:$0xff]   ;;  %v2926_v60 = vld [vmem:[%s3827_s3 + $0x104] ss:$8 sps:$4 sm:$0xff]  }
  0x32   : > { %1348 = vmatpush1.bf16.msra.mxu0 %v2879_v21  ;;  %1461 = vmatpush1.bf16.msra.mxu1 %v2882_v23  ;;  %v471_v61 = vld [vmem:[%s3263_s19 + $0x48] sm:$0xff]  ;;  %v2927_v2 = vld [vmem:[%s3827_s3 + $0xf0] ss:$8 sps:$4 sm:$0xff]   ;;  %v2929_v3 = vld [vmem:[%s3827_s3 + $0xf4] ss:$8 sps:$4 sm:$0xff]  }
  0x33   : > { %1349 = vmatprep.subr.bf16.mxu0 %v2887_v26  ;;  %1462 = vmatprep.subr.bf16.mxu1 %v2890_v28  ;;  %v2921_v62 = vld [vmem:[%s3827_s3] ss:$8 sps:$4 sm:$0xff]   ;;  %v482_v0 = vpack.c.bf16 %v471_v61, %v470_v56  ;;  %v2932_v4 = vld [vmem:[%s3827_s3 + $0x1f4] ss:$8 sps:$4 sm:$0xff]   ;;  %v2930_v7 = vld [vmem:[%s3827_s3 + $0x1f0] ss:$8 sps:$4 sm:$0xff]  }
  0x34   : > { %v2924_v63 = vld [vmem:[%s3827_s3 + $0x100] ss:$8 sps:$4 sm:$0xff]   ;;  %v472_v5 = vld [vmem:[%s3263_s19 + $0x50] sm:$0xff]  ;;  %v473_v6 = vld [vmem:[%s3263_s19 + $0x58] sm:$0xff] }
  0x35   : > { %v2935_v8 = vld [vmem:[%s3827_s3 + $0xe4] ss:$8 sps:$4 sm:$0xff]   ;;  %v2933_v10 = vld [vmem:[%s3827_s3 + $0xe0] ss:$8 sps:$4 sm:$0xff]   ;;  %v483_v12 = vpack.c.bf16 %v473_v6, %v472_v5  ;;  %v2941_v13 = vld [vmem:[%s3827_s3 + $0xd4] ss:$8 sps:$4 sm:$0xff]  }
  0x36   : > { %1350 = vmatpush1.bf16.msra.mxu0 %v2885_v29  ;;  %1463 = vmatpush1.bf16.msra.mxu1 %v2888_v30  ;;  %v2938_v9 = vld [vmem:[%s3827_s3 + $0x1e4] ss:$8 sps:$4 sm:$0xff]   ;;  %v2936_v11 = vld [vmem:[%s3827_s3 + $0x1e0] ss:$8 sps:$4 sm:$0xff]   ;;  %v2944_v14 = vld [vmem:[%s3827_s3 + $0x1d4] ss:$8 sps:$4 sm:$0xff]  }
  0x37   : > { %1351 = vmatprep.subr.bf16.mxu0 %v2893_v32  ;;  %1464 = vmatprep.subr.bf16.mxu1 %v2896_v33  ;;  %v2939_v15 = vld [vmem:[%s3827_s3 + $0xd0] ss:$8 sps:$4 sm:$0xff]   ;;  %v2947_v17 = vld [vmem:[%s3827_s3 + $0xc4] ss:$8 sps:$4 sm:$0xff]   ;;  %v2945_v21 = vld [vmem:[%s3827_s3 + $0xc0] ss:$8 sps:$4 sm:$0xff]  }
  0x38   : > { %2548 = vmatmul.mubr.msk.bf16.gmra.mxu0 %vm604_vm0, %v479_v31  ;;  %2556 = vmatmul.mubr.msk.bf16.gmra.mxu1 %vm604_vm0, %v479_v31  ;;  %v2942_v16 = vld [vmem:[%s3827_s3 + $0x1d0] ss:$8 sps:$4 sm:$0xff]   ;;  %v2950_v18 = vld [vmem:[%s3827_s3 + $0x1c4] ss:$8 sps:$4 sm:$0xff]   ;;  %v2948_v22 = vld [vmem:[%s3827_s3 + $0x1c0] ss:$8 sps:$4 sm:$0xff]  }
  0x39   : > { %681 = vmatprep.mubr.bf16.mxu0 %v3108_v1  ;;  %794 = vmatprep.mubr.bf16.mxu1 %v3108_v1  ;;  %v474_v19 = vld [vmem:[%s3263_s19 + $0x60] sm:$0xff]  ;;  %v475_v20 = vld [vmem:[%s3263_s19 + $0x68] sm:$0xff]  ;;  %v2953_v24 = vld [vmem:[%s3827_s3 + $0xb4] ss:$8 sps:$4 sm:$0xff]  }
  0x3a   : > { %1352 = vmatpush1.bf16.msra.mxu0 %v2891_v35  ;;  %1465 = vmatpush1.bf16.msra.mxu1 %v2894_v36  ;;  %v484_v23 = vpack.c.bf16 %v475_v20, %v474_v19  ;;  %v2956_v25 = vld [vmem:[%s3827_s3 + $0x1b4] ss:$8 sps:$4 sm:$0xff]   ;;  %v2951_v26 = vld [vmem:[%s3827_s3 + $0xb0] ss:$8 sps:$4 sm:$0xff]   ;;  %v2959_v31 = vld [vmem:[%s3827_s3 + $0xa4] ss:$8 sps:$4 sm:$0xff]  }
  0x3b   : > { %1353 = vmatprep.subr.bf16.mxu0 %v2899_v37  ;;  %1466 = vmatprep.subr.bf16.mxu1 %v2902_v38  ;;  %v2954_v27 = vld [vmem:[%s3827_s3 + $0x1b0] ss:$8 sps:$4 sm:$0xff]   ;;  %v2962_v32 = vld [vmem:[%s3827_s3 + $0x1a4] ss:$8 sps:$4 sm:$0xff]   ;;  %v2960_v33 = vld [vmem:[%s3827_s3 + $0x1a0] ss:$8 sps:$4 sm:$0xff]  }
  0x3c   : > { %v476_v28 = vld [vmem:[%s3263_s19 + $0x70] sm:$0xff]  ;;  %v477_v29 = vld [vmem:[%s3263_s19 + $0x78] sm:$0xff]  ;;  %v2971_v38 = vld [vmem:[%s3827_s3 + $0x84] ss:$8 sps:$4 sm:$0xff]  }
  0x3d   : > { %v485_v30 = vpack.c.bf16 %v477_v29, %v476_v28  ;;  %v2965_v34 = vld [vmem:[%s3827_s3 + $0x94] ss:$8 sps:$4 sm:$0xff]   ;;  %v2963_v36 = vld [vmem:[%s3827_s3 + $0x90] ss:$8 sps:$4 sm:$0xff]   ;;  %v2974_v39 = vld [vmem:[%s3827_s3 + $0x184] ss:$8 sps:$4 sm:$0xff]  }
  0x3e   : > { %1354 = vmatpush1.bf16.msra.mxu0 %v2897_v40  ;;  %1467 = vmatpush1.bf16.msra.mxu1 %v2900_v41  ;;  %v2968_v35 = vld [vmem:[%s3827_s3 + $0x194] ss:$8 sps:$4 sm:$0xff]   ;;  %v2966_v37 = vld [vmem:[%s3827_s3 + $0x190] ss:$8 sps:$4 sm:$0xff]   ;;  %v2969_v40 = vld [vmem:[%s3827_s3 + $0x80] ss:$8 sps:$4 sm:$0xff]  }
  0x3f   : > { %1355 = vmatprep.subr.bf16.mxu0 %v2905_v43  ;;  %1468 = vmatprep.subr.bf16.mxu1 %v2908_v44  ;;  %v2972_v41 = vld [vmem:[%s3827_s3 + $0x180] ss:$8 sps:$4 sm:$0xff]   ;;  %v504_v43 = vlaneseq }
  0x40   : > { %2549 = vmatmul.mubr.msk.bf16.gmra.mxu0 %vm604_vm0, %v480_v42  ;;  %2557 = vmatmul.mubr.msk.bf16.gmra.mxu1 %vm604_vm0, %v480_v42  ;;  %v2975_v42 = vld [vmem:[#allocation3 + $0x78] sm:$0xff]  }
  0x41   : > { %691 = vmatprep.mubr.bf16.mxu0 %v3108_v1  ;;  %804 = vmatprep.mubr.bf16.mxu1 %v3108_v1  ;;  %v3509_v44 = vshrl.u32 %v504_v43, 7 }
  0x42   : > { %1356 = vmatpush1.bf16.msra.mxu0 %v2903_v46  ;;  %1469 = vmatpush1.bf16.msra.mxu1 %v2906_v47 }
  0x43   : > { %1357 = vmatprep.subr.bf16.mxu0 %v2911_v48  ;;  %1470 = vmatprep.subr.bf16.mxu1 %v2914_v49  ;;  %v510_v45 = vsub.s32 1, %v3509_v44  ;;  %v518_v46 = vsub.s32 3, %v3509_v44  ;;  %v3514_v47 = vsub.s32 0, %v3509_v44  ;;  %v514_v48 = vsub.s32 2, %v3509_v44  ;;  %v502_v49 = vld [vmem:[%s3826_s2] sm:$0xf] }
  0x46   : > { %1358 = vmatpush1.bf16.msra.mxu0 %v2909_v51  ;;  %1471 = vmatpush1.bf16.msra.mxu1 %v2912_v52  ;;  %v3522_v52 = vrot.slane %v502_v49, %v510_v45 }
  0x47   : > { %1359 = vmatprep.subr.bf16.mxu0 %v2917_v54  ;;  %1472 = vmatprep.subr.bf16.mxu1 %v2920_v55  ;;  %v3527_v54 = vrot.slane %v502_v49, %v3514_v47  ;;  %v3529_v55 = vrot.slane %v502_v49, %v514_v48 }
  0x48   : > { %2550 = vmatmul.mubr.msk.bf16.gmra.mxu0 %vm604_vm0, %v481_v53  ;;  %2558 = vmatmul.mubr.msk.bf16.gmra.mxu1 %vm604_vm0, %v481_v53  ;;  %v3524_v53 = vrot.slane %v502_v49, %v518_v46 }
  0x49   : > { %701 = vmatprep.mubr.bf16.mxu0 %v3108_v1  ;;  %814 = vmatprep.mubr.bf16.mxu1 %v3108_v1 }
  0x4a   : > { %1360 = vmatpush1.bf16.msra.mxu0 %v2915_v57  ;;  %1473 = vmatpush1.bf16.msra.mxu1 %v2918_v58 }
  0x4b   : > { %1361 = vmatprep.subr.bf16.mxu0 %v2923_v59  ;;  %1474 = vmatprep.subr.bf16.mxu1 %v2926_v60 }
  0x4e   : > { %1362 = vmatpush1.bf16.msra.mxu0 %v2921_v62  ;;  %1475 = vmatpush1.bf16.msra.mxu1 %v2924_v63 }
  0x4f   : > { %1363 = vmatprep.subr.bf16.mxu0 %v2929_v3  ;;  %1476 = vmatprep.subr.bf16.mxu1 %v2932_v4 }
  0x50   : > { %2551 = vmatmul.mubr.msk.bf16.gmra.mxu0 %vm604_vm0, %v482_v0  ;;  %2559 = vmatmul.mubr.msk.bf16.gmra.mxu1 %vm604_vm0, %v482_v0 }
  0x51   : > { %711 = vmatprep.mubr.bf16.mxu0 %v3108_v1  ;;  %824 = vmatprep.mubr.bf16.mxu1 %v3108_v1 }
  0x52   : > { %1364 = vmatpush2.bf16.msra.mxu0 %v2927_v2  ;;  %1477 = vmatpush2.bf16.msra.mxu1 %v2930_v7 }
  0x53   : > { %1365 = vmatprep.subr.bf16.mxu0 %v2935_v8  ;;  %1478 = vmatprep.subr.bf16.mxu1 %v2938_v9 }
  0x56   : > { %1366 = vmatpush2.bf16.msra.mxu0 %v2933_v10  ;;  %1479 = vmatpush2.bf16.msra.mxu1 %v2936_v11 }
  0x57   : > { %1367 = vmatprep.subr.bf16.mxu0 %v2941_v13  ;;  %1480 = vmatprep.subr.bf16.mxu1 %v2944_v14 }
  0x58   : > { %2552 = vmatmul.mubr.msk.bf16.gmra.mxu0 %vm604_vm0, %v483_v12  ;;  %2560 = vmatmul.mubr.msk.bf16.gmra.mxu1 %vm604_vm0, %v483_v12 }
  0x59   : > { %721 = vmatprep.mubr.bf16.mxu0 %v3108_v1  ;;  %834 = vmatprep.mubr.bf16.mxu1 %v3108_v1 }
  0x5a   : > { %1368 = vmatpush2.bf16.msra.mxu0 %v2939_v15  ;;  %1481 = vmatpush2.bf16.msra.mxu1 %v2942_v16 }
  0x5b   : > { %1369 = vmatprep.subr.bf16.mxu0 %v2947_v17  ;;  %1482 = vmatprep.subr.bf16.mxu1 %v2950_v18 }
  0x5e   : > { %1370 = vmatpush2.bf16.msra.mxu0 %v2945_v21  ;;  %1483 = vmatpush2.bf16.msra.mxu1 %v2948_v22  ;;  %v2976_v21 = vld [vmem:[#allocation3 + $0x38] sm:$0xff]  }
  0x5f   : > { %1371 = vmatprep.subr.bf16.mxu0 %v2953_v24  ;;  %1484 = vmatprep.subr.bf16.mxu1 %v2956_v25 }
  0x60   : > { %2553 = vmatmul.mubr.msk.bf16.gmra.mxu0 %vm604_vm0, %v484_v23  ;;  %2561 = vmatmul.mubr.msk.bf16.gmra.mxu1 %vm604_vm0, %v484_v23 }
  0x61   : > { %731 = vmatprep.mubr.bf16.mxu0 %v3108_v1  ;;  %844 = vmatprep.mubr.bf16.mxu1 %v3108_v1  ;;  %v2957_v1 = vld [vmem:[%s3827_s3 + $0xa0] ss:$8 sps:$4 sm:$0xff]  }
  0x62   : > { %1372 = vmatpush2.bf16.msra.mxu0 %v2951_v26  ;;  %1485 = vmatpush2.bf16.msra.mxu1 %v2954_v27  ;;  %v2977_v27 = vld [vmem:[#allocation3 + $0x70] sm:$0xff]  }
  0x63   : > { %1373 = vmatprep.subr.bf16.mxu0 %v2959_v31  ;;  %1486 = vmatprep.subr.bf16.mxu1 %v2962_v32 }
  0x66   : > { %1374 = vmatpush2.bf16.msra.mxu0 %v2957_v1  ;;  %1487 = vmatpush2.bf16.msra.mxu1 %v2960_v33 }
  0x67   : > { %1375 = vmatprep.subr.bf16.mxu0 %v2965_v34  ;;  %1488 = vmatprep.subr.bf16.mxu1 %v2968_v35 }
  0x68   : > { %2554 = vmatmul.mubr.msk.bf16.gmra.mxu0 %vm604_vm0, %v485_v30  ;;  %2562 = vmatmul.mubr.msk.bf16.gmra.mxu1 %vm604_vm0, %v485_v30 }
  0x6a   : > { %1376 = vmatpush2.bf16.msra.mxu0 %v2963_v36  ;;  %1489 = vmatpush2.bf16.msra.mxu1 %v2966_v37  ;;  %v2978_v36 = vld [vmem:[#allocation3 + $0x30] sm:$0xff]  }
  0x6b   : > { %1377 = vmatprep.subr.bf16.mxu0 %v2971_v38  ;;  %1490 = vmatprep.subr.bf16.mxu1 %v2974_v39 }
  0x6e   : > { %1378 = vmatpush2.bf16.msra.mxu0 %v2969_v40  ;;  %1491 = vmatpush2.bf16.msra.mxu1 %v2972_v41  ;;  %v2979_v41 = vld [vmem:[#allocation3 + $0x68] sm:$0xff]  }
  0x6f   : > { %2685 = vmatprep.subr.bf16.mxu0 %v2975_v42 }
  0xf0   : > { %v663_v50 = vpop.f32.mrf.mxu0  ;;  %v776_v51 = vpop.f32.mrf.mxu1 }
  0xf1   : > { %v664_v0 = vadd.f32 %v663_v50, %v3527_v54  ;;  %v777_v2 = vadd.f32 %v776_v51, %v3529_v55 }
  0xf2   : > { %v665_v56 = vpop.f32.mrf.mxu0  ;;  %v778_v57 = vpop.f32.mrf.mxu1 }
  0xf3   : > { %v666_v60 = vadd.f32 %v665_v56, %v3522_v52  ;;  %v779_v61 = vadd.f32 %v778_v57, %v3524_v53  ;;  %v855_v15 = vmax.f32 %v664_v0, 0.0  ;;  %v857_v16 = vmax.f32 %v777_v2, 0.0  ;;  %v2981_v2 = vld [vmem:[#allocation3 + $0x60] sm:$0xff]  }
  0xf4   : > { %v667_v58 = vpop.f32.mrf.mxu0  ;;  %v780_v59 = vpop.f32.mrf.mxu1 }
  0xf5   : > { %v668_v62 = vadd.f32 %v667_v58, %v3527_v54  ;;  %v781_v63 = vadd.f32 %v780_v59, %v3529_v55  ;;  %v856_v11 = vmax.f32 %v666_v60, 0.0  ;;  %v858_v12 = vmax.f32 %v779_v61, 0.0  ;;  %v2980_v59 = vld [vmem:[#allocation3 + $0x28] sm:$0xff]  }
  0xf6   : > { %v669_v3 = vpop.f32.mrf.mxu0  ;;  %v782_v4 = vpop.f32.mrf.mxu1 }
  0xf7   : > { %v670_v5 = vadd.f32 %v669_v3, %v3522_v52  ;;  %v783_v6 = vadd.f32 %v782_v4, %v3524_v53  ;;  %v859_v7 = vmax.f32 %v668_v62, 0.0  ;;  %v861_v8 = vmax.f32 %v781_v63, 0.0 }
  0xf8   : > { %v673_v9 = vpop.f32.mrf.mxu0  ;;  %v786_v10 = vpop.f32.mrf.mxu1 }
  0xf9   : > { %v860_v13 = vmax.f32 %v670_v5, 0.0  ;;  %v862_v14 = vmax.f32 %v783_v6, 0.0  ;;  %v919_v22 = vpack.c.bf16 %v859_v7, %v855_v15  ;;  %v921_v23 = vpack.c.bf16 %v861_v8, %v857_v16 }
  0xfa   : > { %v675_v17 = vpop.f32.mrf.mxu0  ;;  %v788_v18 = vpop.f32.mrf.mxu1  ;;  %v674_v31 = vadd.f32 %v673_v9, %v3527_v54  ;;  %v787_v32 = vadd.f32 %v786_v10, %v3529_v55 }
  0xfb   : > { %v920_v19 = vpack.c.bf16 %v860_v13, %v856_v11  ;;  %v922_v20 = vpack.c.bf16 %v862_v14, %v858_v12  ;;  %v676_v24 = vadd.f32 %v675_v17, %v3522_v52  ;;  %v789_v28 = vadd.f32 %v788_v18, %v3524_v53  ;;  %v2982_v12 = vld [vmem:[#allocation3 + $0x20] sm:$0xff]   ;;  %v2983_v17 = vld [vmem:[#allocation3 + $0x58] sm:$0xff]  }
  0xfc   : > { %v677_v25 = vpop.f32.mrf.mxu0  ;;  %v790_v26 = vpop.f32.mrf.mxu1  ;;  %v863_v49 = vmax.f32 %v674_v31, 0.0  ;;  %v865_v50 = vmax.f32 %v787_v32, 0.0 }
  0xfd   : > { %v678_v29 = vadd.f32 %v677_v25, %v3527_v54  ;;  %v791_v30 = vadd.f32 %v790_v26, %v3529_v55  ;;  %1379 = vmatprep.mubr.bf16.mxu0 %v920_v19  ;;  %1492 = vmatprep.mubr.bf16.mxu1 %v922_v20  ;;  %v864_v42 = vmax.f32 %v676_v24, 0.0  ;;  %v866_v43 = vmax.f32 %v789_v28, 0.0  ;;  %v2984_v28 = vld [vmem:[#allocation3 + $0x18] sm:$0xff]  }
  0xfe   : > { %v679_v1 = vpop.f32.mrf.mxu0  ;;  %v792_v33 = vpop.f32.mrf.mxu1  ;;  %1380 = vmatmul.mubr.bf16.vlgmr.msra.gmra.mxu0 %v919_v22  ;;  %1493 = vmatmul.mubr.bf16.vlgmr.msra.gmra.mxu1 %v921_v23 }
  0xff   : > { %v680_v34 = vadd.f32 %v679_v1, %v3522_v52  ;;  %v793_v35 = vadd.f32 %v792_v33, %v3524_v53  ;;  %2686 = vmatpush3.bf16.msra.mxu0 %v2976_v21  ;;  %v867_v37 = vmax.f32 %v678_v29, 0.0  ;;  %v869_v38 = vmax.f32 %v791_v30, 0.0  ;;  %v2985_v33 = vld [vmem:[#allocation3 + $0x50] sm:$0xff]  }
 0x100   : > { %v683_v39 = vpop.f32.mrf.mxu0  ;;  %v796_v40 = vpop.f32.mrf.mxu1  ;;  %2687 = vmatprep.subr.bf16.mxu0 %v2977_v27 }
 0x101   : > { %v868_v46 = vmax.f32 %v680_v34, 0.0  ;;  %v870_v48 = vmax.f32 %v793_v35, 0.0  ;;  %v923_v60 = vpack.c.bf16 %v867_v37, %v863_v49  ;;  %v925_v61 = vpack.c.bf16 %v869_v38, %v865_v50 }
 0x102   : > { %v685_v51 = vpop.f32.mrf.mxu0  ;;  %v798_v56 = vpop.f32.mrf.mxu1  ;;  %v684_v6 = vadd.f32 %v683_v39, %v3527_v54  ;;  %v797_v7 = vadd.f32 %v796_v40, %v3529_v55 }
 0x103   : > { %v924_v57 = vpack.c.bf16 %v868_v46, %v864_v42  ;;  %v926_v58 = vpack.c.bf16 %v870_v48, %v866_v43  ;;  %2688 = vmatpush3.bf16.msra.mxu0 %v2978_v36  ;;  %v686_v62 = vadd.f32 %v685_v51, %v3522_v52  ;;  %v799_v3 = vadd.f32 %v798_v56, %v3524_v53  ;;  %v2986_v43 = vld [vmem:[#allocation3 + $0x10] sm:$0xff]   ;;  %v2987_v51 = vld [vmem:[#allocation3 + $0x48] sm:$0xff]  }
 0x104   : > { %v687_v63 = vpop.f32.mrf.mxu0  ;;  %v800_v0 = vpop.f32.mrf.mxu1  ;;  %2689 = vmatprep.subr.bf16.mxu0 %v2979_v41  ;;  %v871_v22 = vmax.f32 %v684_v6, 0.0  ;;  %v873_v23 = vmax.f32 %v797_v7, 0.0 }
 0x105   : > { %v688_v4 = vadd.f32 %v687_v63, %v3527_v54  ;;  %v801_v5 = vadd.f32 %v800_v0, %v3529_v55  ;;  %1389 = vmatprep.mubr.bf16.mxu0 %v924_v57  ;;  %1502 = vmatprep.mubr.bf16.mxu1 %v926_v58  ;;  %v872_v18 = vmax.f32 %v686_v62, 0.0  ;;  %v874_v19 = vmax.f32 %v799_v3, 0.0 }
 0x106   : > { %v689_v8 = vpop.f32.mrf.mxu0  ;;  %v802_v9 = vpop.f32.mrf.mxu1  ;;  %1390 = vmatmul.mubr.bf16.gmra.mxu0 %v923_v60  ;;  %1503 = vmatmul.mubr.bf16.gmra.mxu1 %v925_v61 }
 0x107   : > { %v690_v10 = vadd.f32 %v689_v8, %v3522_v52  ;;  %v803_v11 = vadd.f32 %v802_v9, %v3524_v53  ;;  %2690 = vmatpush3.bf16.msra.mxu0 %v2980_v59  ;;  %v875_v13 = vmax.f32 %v688_v4, 0.0  ;;  %v877_v14 = vmax.f32 %v801_v5, 0.0 }
 0x108   : > { %v693_v15 = vpop.f32.mrf.mxu0  ;;  %v806_v16 = vpop.f32.mrf.mxu1  ;;  %2691 = vmatprep.subr.bf16.mxu0 %v2981_v2 }
 0x109   : > { %v876_v20 = vmax.f32 %v690_v10, 0.0  ;;  %v878_v21 = vmax.f32 %v803_v11, 0.0  ;;  %v927_v29 = vpack.c.bf16 %v875_v13, %v871_v22  ;;  %v929_v30 = vpack.c.bf16 %v877_v14, %v873_v23 }
 0x10a   : > { %v695_v24 = vpop.f32.mrf.mxu0  ;;  %v808_v25 = vpop.f32.mrf.mxu1  ;;  %v694_v37 = vadd.f32 %v693_v15, %v3527_v54  ;;  %v807_v38 = vadd.f32 %v806_v16, %v3529_v55 }
 0x10b   : > { %v928_v26 = vpack.c.bf16 %v876_v20, %v872_v18  ;;  %v930_v27 = vpack.c.bf16 %v878_v21, %v874_v19  ;;  %2692 = vmatpush3.bf16.msra.mxu0 %v2982_v12  ;;  %v696_v31 = vadd.f32 %v695_v24, %v3522_v52  ;;  %v809_v34 = vadd.f32 %v808_v25, %v3524_v53 }
 0x10c   : > { %v697_v32 = vpop.f32.mrf.mxu0  ;;  %v810_v1 = vpop.f32.mrf.mxu1  ;;  %2693 = vmatprep.subr.bf16.mxu0 %v2983_v17  ;;  %v879_v60 = vmax.f32 %v694_v37, 0.0  ;;  %v881_v61 = vmax.f32 %v807_v38, 0.0 }
 0x10d   : > { %v698_v35 = vadd.f32 %v697_v32, %v3527_v54  ;;  %v811_v36 = vadd.f32 %v810_v1, %v3529_v55  ;;  %1399 = vmatprep.mubr.bf16.mxu0 %v928_v26  ;;  %1512 = vmatprep.mubr.bf16.mxu1 %v930_v27  ;;  %v880_v56 = vmax.f32 %v696_v31, 0.0  ;;  %v882_v57 = vmax.f32 %v809_v34, 0.0 }
 0x10e   : > { %v699_v39 = vpop.f32.mrf.mxu0  ;;  %v812_v40 = vpop.f32.mrf.mxu1  ;;  %1400 = vmatmul.mubr.bf16.gmra.mxu0 %v927_v29  ;;  %1513 = vmatmul.mubr.bf16.gmra.mxu1 %v929_v30 }
 0x10f   : > { %v700_v41 = vadd.f32 %v699_v39, %v3522_v52  ;;  %v813_v42 = vadd.f32 %v812_v40, %v3524_v53  ;;  %2694 = vmatpush3.bf16.msra.mxu0 %v2984_v28  ;;  %v883_v46 = vmax.f32 %v698_v35, 0.0  ;;  %v885_v48 = vmax.f32 %v811_v36, 0.0 }
 0x110   : > { %v703_v49 = vpop.f32.mrf.mxu0  ;;  %v816_v50 = vpop.f32.mrf.mxu1  ;;  %2695 = vmatprep.subr.bf16.mxu0 %v2985_v33 }
 0x111   : > { %v884_v58 = vmax.f32 %v700_v41, 0.0  ;;  %v886_v59 = vmax.f32 %v813_v42, 0.0  ;;  %v931_v3 = vpack.c.bf16 %v883_v46, %v879_v60  ;;  %v933_v4 = vpack.c.bf16 %v885_v48, %v881_v61 }
 0x112   : > { %v705_v62 = vpop.f32.mrf.mxu0  ;;  %v818_v63 = vpop.f32.mrf.mxu1  ;;  %v704_v11 = vadd.f32 %v703_v49, %v3527_v54  ;;  %v817_v12 = vadd.f32 %v816_v50, %v3529_v55 }
 0x113   : > { %v932_v0 = vpack.c.bf16 %v884_v58, %v880_v56  ;;  %v934_v2 = vpack.c.bf16 %v886_v59, %v882_v57  ;;  %2696 = vmatpush3.bf16.msra.mxu0 %v2986_v43  ;;  %v706_v5 = vadd.f32 %v705_v62, %v3522_v52  ;;  %v819_v8 = vadd.f32 %v818_v63, %v3524_v53 }
 0x114   : > { %v707_v6 = vpop.f32.mrf.mxu0  ;;  %v820_v7 = vpop.f32.mrf.mxu1  ;;  %2697 = vmatprep.subr.bf16.mxu0 %v2987_v51  ;;  %v887_v25 = vmax.f32 %v704_v11, 0.0  ;;  %v889_v26 = vmax.f32 %v817_v12, 0.0 }
 0x115   : > { %v708_v9 = vadd.f32 %v707_v6, %v3527_v54  ;;  %v821_v10 = vadd.f32 %v820_v7, %v3529_v55  ;;  %1409 = vmatprep.mubr.bf16.mxu0 %v932_v0  ;;  %1522 = vmatprep.mubr.bf16.mxu1 %v934_v2  ;;  %v888_v21 = vmax.f32 %v706_v5, 0.0  ;;  %v890_v22 = vmax.f32 %v819_v8, 0.0 }
 0x116   : > { %v709_v13 = vpop.f32.mrf.mxu0  ;;  %v822_v14 = vpop.f32.mrf.mxu1  ;;  %1410 = vmatmul.mubr.bf16.gmra.mxu0 %v931_v3  ;;  %1523 = vmatmul.mubr.bf16.gmra.mxu1 %v933_v4 }
 0x117   : > { %v710_v15 = vadd.f32 %v709_v13, %v3522_v52  ;;  %v823_v16 = vadd.f32 %v822_v14, %v3524_v53  ;;  %v891_v17 = vmax.f32 %v708_v9, 0.0  ;;  %v893_v18 = vmax.f32 %v821_v10, 0.0 }
 0x118   : > { %v713_v19 = vpop.f32.mrf.mxu0  ;;  %v826_v20 = vpop.f32.mrf.mxu1 }
 0x119   : > { %v892_v23 = vmax.f32 %v710_v15, 0.0  ;;  %v894_v24 = vmax.f32 %v823_v16, 0.0  ;;  %v935_v31 = vpack.c.bf16 %v891_v17, %v887_v25  ;;  %v937_v32 = vpack.c.bf16 %v893_v18, %v889_v26 }
 0x11a   : > { %v715_v27 = vpop.f32.mrf.mxu0  ;;  %v828_v28 = vpop.f32.mrf.mxu1  ;;  %v714_v38 = vadd.f32 %v713_v19, %v3527_v54  ;;  %v827_v39 = vadd.f32 %v826_v20, %v3529_v55 }
 0x11b   : > { %v936_v29 = vpack.c.bf16 %v892_v23, %v888_v21  ;;  %v938_v30 = vpack.c.bf16 %v894_v24, %v890_v22  ;;  %v716_v1 = vadd.f32 %v715_v27, %v3522_v52  ;;  %v829_v35 = vadd.f32 %v828_v28, %v3524_v53 }
 0x11c   : > { %v717_v33 = vpop.f32.mrf.mxu0  ;;  %v830_v34 = vpop.f32.mrf.mxu1  ;;  %v895_v59 = vmax.f32 %v714_v38, 0.0  ;;  %v897_v60 = vmax.f32 %v827_v39, 0.0 }
 0x11d   : > { %v718_v36 = vadd.f32 %v717_v33, %v3527_v54  ;;  %v831_v37 = vadd.f32 %v830_v34, %v3529_v55  ;;  %1419 = vmatprep.mubr.bf16.mxu0 %v936_v29  ;;  %1532 = vmatprep.mubr.bf16.mxu1 %v938_v30  ;;  %v896_v51 = vmax.f32 %v716_v1, 0.0  ;;  %v898_v56 = vmax.f32 %v829_v35, 0.0 }
 0x11e   : > { %v719_v40 = vpop.f32.mrf.mxu0  ;;  %v832_v41 = vpop.f32.mrf.mxu1  ;;  %1420 = vmatmul.mubr.bf16.gmra.mxu0 %v935_v31  ;;  %1533 = vmatmul.mubr.bf16.gmra.mxu1 %v937_v32 }
 0x11f   : > { %v720_v42 = vadd.f32 %v719_v40, %v3522_v52  ;;  %v833_v43 = vadd.f32 %v832_v41, %v3524_v53  ;;  %v899_v46 = vmax.f32 %v718_v36, 0.0  ;;  %v901_v48 = vmax.f32 %v831_v37, 0.0 }
 0x120   : > { %v723_v49 = vpop.f32.mrf.mxu0  ;;  %v836_v50 = vpop.f32.mrf.mxu1 }
 0x121   : > { %v900_v57 = vmax.f32 %v720_v42, 0.0  ;;  %v902_v58 = vmax.f32 %v833_v43, 0.0  ;;  %v939_v2 = vpack.c.bf16 %v899_v46, %v895_v59  ;;  %v941_v3 = vpack.c.bf16 %v901_v48, %v897_v60  ;;  %v2988_v60 = vld [vmem:[#allocation3 + $0x8] sm:$0xff]  }
 0x122   : > { %v725_v61 = vpop.f32.mrf.mxu0  ;;  %v838_v62 = vpop.f32.mrf.mxu1  ;;  %v724_v10 = vadd.f32 %v723_v49, %v3527_v54  ;;  %v837_v11 = vadd.f32 %v836_v50, %v3529_v55  ;;  %2698 = vmatpush3.bf16.msra.mxu0 %v2988_v60 }
 0x123   : > { %v940_v63 = vpack.c.bf16 %v900_v57, %v896_v51  ;;  %v942_v0 = vpack.c.bf16 %v902_v58, %v898_v56  ;;  %v726_v4 = vadd.f32 %v725_v61, %v3522_v52  ;;  %v839_v7 = vadd.f32 %v838_v62, %v3524_v53  ;;  %v2991_v61 = vld [vmem:[%s3831_s7 + $0x38] sm:$0xff]   ;;  %v2992_v62 = vld [vmem:[%s3831_s7 + $0x30] sm:$0xff]  }
 0x124   : > { %v727_v5 = vpop.f32.mrf.mxu0  ;;  %v840_v6 = vpop.f32.mrf.mxu1  ;;  %v903_v24 = vmax.f32 %v724_v10, 0.0  ;;  %v905_v25 = vmax.f32 %v837_v11, 0.0  ;;  %2777 = vmatprep.subr.bf16.mxu1 %v2991_v61 }
 0x125   : > { %v728_v8 = vadd.f32 %v727_v5, %v3527_v54  ;;  %v841_v9 = vadd.f32 %v840_v6, %v3529_v55  ;;  %1429 = vmatprep.mubr.bf16.mxu0 %v940_v63  ;;  %1542 = vmatprep.mubr.bf16.mxu1 %v942_v0  ;;  %v904_v20 = vmax.f32 %v726_v4, 0.0  ;;  %v906_v21 = vmax.f32 %v839_v7, 0.0  ;;  %v2993_v63 = vld [vmem:[%s3831_s7 + $0x28] sm:$0xff]   ;;  %v1015_v0 = vld [vmem:[%s3828_s4] sm:$0x3] }
 0x126   : > { %v729_v12 = vpop.f32.mrf.mxu0  ;;  %v842_v13 = vpop.f32.mrf.mxu1  ;;  %1430 = vmatmul.mubr.bf16.gmra.mxu0 %v939_v2  ;;  %1543 = vmatmul.mubr.bf16.gmra.mxu1 %v941_v3  ;;  %v3609_v2 = vrot.slane %v1015_v0, %v510_v45  ;;  %v3612_v3 = vrot.slane %v1015_v0, %v3514_v47 }
 0x127   : > { %v730_v14 = vadd.f32 %v729_v12, %v3522_v52  ;;  %v843_v15 = vadd.f32 %v842_v13, %v3524_v53  ;;  %v907_v16 = vmax.f32 %v728_v8, 0.0  ;;  %v909_v17 = vmax.f32 %v841_v9, 0.0  ;;  %2778 = vmatpush3.bf16.msra.mxu1 %v2991_v61 }
 0x128   : > { %v733_v18 = vpop.f32.mrf.mxu0  ;;  %v846_v19 = vpop.f32.mrf.mxu1  ;;  %2779 = vmatprep.subr.bf16.mxu1 %v2992_v62 }
 0x129   : > { %v908_v22 = vmax.f32 %v730_v14, 0.0  ;;  %v910_v23 = vmax.f32 %v843_v15, 0.0  ;;  %v943_v30 = vpack.c.bf16 %v907_v16, %v903_v24  ;;  %v945_v31 = vpack.c.bf16 %v909_v17, %v905_v25 }
 0x12a   : > { %v735_v26 = vpop.f32.mrf.mxu0  ;;  %v848_v27 = vpop.f32.mrf.mxu1  ;;  %v734_v37 = vadd.f32 %v733_v18, %v3527_v54  ;;  %v847_v38 = vadd.f32 %v846_v19, %v3529_v55 }
 0x12b   : > { %v944_v28 = vpack.c.bf16 %v908_v22, %v904_v20  ;;  %v946_v29 = vpack.c.bf16 %v910_v23, %v906_v21  ;;  %v736_v32 = vadd.f32 %v735_v26, %v3522_v52  ;;  %v849_v34 = vadd.f32 %v848_v27, %v3524_v53  ;;  %2780 = vmatpush3.bf16.msra.mxu1 %v2992_v62 }
 0x12c   : > { %v737_v1 = vpop.f32.mrf.mxu0  ;;  %v850_v33 = vpop.f32.mrf.mxu1  ;;  %v911_v56 = vmax.f32 %v734_v37, 0.0  ;;  %v913_v57 = vmax.f32 %v847_v38, 0.0  ;;  %2781 = vmatprep.subr.bf16.mxu1 %v2993_v63 }
 0x12d   : > { %v738_v35 = vadd.f32 %v737_v1, %v3527_v54  ;;  %v851_v36 = vadd.f32 %v850_v33, %v3529_v55  ;;  %1439 = vmatprep.mubr.bf16.mxu0 %v944_v28  ;;  %1552 = vmatprep.mubr.bf16.mxu1 %v946_v29  ;;  %v912_v48 = vmax.f32 %v736_v32, 0.0  ;;  %v914_v49 = vmax.f32 %v849_v34, 0.0 }
 0x12e   : > { %v739_v39 = vpop.f32.mrf.mxu0  ;;  %v852_v40 = vpop.f32.mrf.mxu1  ;;  %1440 = vmatmul.mubr.bf16.gmra.mxu0 %v943_v30  ;;  %1553 = vmatmul.mubr.bf16.gmra.mxu1 %v945_v31 }
 0x12f   : > { %v740_v41 = vadd.f32 %v739_v39, %v3522_v52  ;;  %v853_v42 = vadd.f32 %v852_v40, %v3524_v53  ;;  %v915_v43 = vmax.f32 %v738_v35, 0.0  ;;  %v917_v46 = vmax.f32 %v851_v36, 0.0  ;;  %v2989_v52 = vld [vmem:[#allocation3 + $0x40] sm:$0xff]   ;;  %2782 = vmatpush3.bf16.msra.mxu1 %v2993_v63 }
 0x130   : > { %v2990_v53 = vld [vmem:[#allocation3] sm:$0xff]   ;;  %2699 = vmatprep.subr.bf16.mxu0 %v2989_v52 }
 0x131   : > { %v916_v50 = vmax.f32 %v740_v41, 0.0  ;;  %v918_v51 = vmax.f32 %v853_v42, 0.0  ;;  %v947_v59 = vpack.c.bf16 %v915_v43, %v911_v56  ;;  %v949_v55 = vpack.c.bf16 %v917_v46, %v913_v57  ;;  %2700 = vmatpush3.bf16.msra.mxu0 %v2990_v53 }
 0x133   : > { %v948_v58 = vpack.c.bf16 %v916_v50, %v912_v48  ;;  %v950_v54 = vpack.c.bf16 %v918_v51, %v914_v49 }
 0x135   : > { %1449 = vmatprep.mubr.bf16.mxu0 %v948_v58  ;;  %1562 = vmatprep.mubr.bf16.mxu1 %v950_v54 }
 0x136   : > { %1450 = vmatmul.mubr.bf16.gmra.mxu0 %v947_v59  ;;  %1563 = vmatmul.mubr.bf16.gmra.mxu1 %v949_v55 }
 0x1be   : > { %v1381_v4 = vpop.f32.mrf.mxu0  ;;  %v1494_v5 = vpop.f32.mrf.mxu1 }
 0x1bf   : > { %v1382_v9 = vadd.f32 %v1381_v4, %v3612_v3 }
 0x1c0   : > { %v1383_v6 = vpop.f32.mrf.mxu0  ;;  %v1496_v7 = vpop.f32.mrf.mxu1 }
 0x1c1   : > { %v1384_v8 = vadd.f32 %v1383_v6, %v3609_v2  ;;  %v1495_v16 = vadd.f32 %v1494_v5, %v1382_v9 }
 0x1c2   : > { %v1385_v10 = vpop.f32.mrf.mxu0  ;;  %v1498_v11 = vpop.f32.mrf.mxu1 }
 0x1c3   : > { %v1386_v12 = vadd.f32 %v1385_v10, %v3612_v3  ;;  %v1497_v44 = vadd.f32 %v1496_v7, %v1384_v8  ;;  %v1573_v26 = vmax.f32 %v1495_v16, 0.0 }
 0x1c4   : > { %v1387_v13 = vpop.f32.mrf.mxu0  ;;  %v1500_v14 = vpop.f32.mrf.mxu1 }
 0x1c5   : > { %v1499_v45 = vadd.f32 %v1498_v11, %v1386_v12  ;;  %v1388_v15 = vadd.f32 %v1387_v13, %v3609_v2  ;;  %v1574_v23 = vmax.f32 %v1497_v44, 0.0 }
 0x1c6   : > { %v1391_v17 = vpop.f32.mrf.mxu0  ;;  %v1504_v18 = vpop.f32.mrf.mxu1 }
 0x1c7   : > { %v1501_v19 = vadd.f32 %v1500_v14, %v1388_v15  ;;  %v1575_v20 = vmax.f32 %v1499_v45, 0.0  ;;  %v1392_v27 = vadd.f32 %v1391_v17, %v3612_v3 }
 0x1c8   : > { %v1393_v21 = vpop.f32.mrf.mxu0  ;;  %v1506_v22 = vpop.f32.mrf.mxu1 }
 0x1c9   : > { %v1576_v24 = vmax.f32 %v1501_v19, 0.0  ;;  %v1394_v25 = vadd.f32 %v1393_v21, %v3609_v2  ;;  %v1605_v32 = vpack.c.bf16 %v1575_v20, %v1573_v26  ;;  %v1505_v37 = vadd.f32 %v1504_v18, %v1392_v27 }
 0x1ca   : > { %v1395_v28 = vpop.f32.mrf.mxu0  ;;  %v1508_v29 = vpop.f32.mrf.mxu1 }
 0x1cb   : > { %v1606_v30 = vpack.c.bf16 %v1576_v24, %v1574_v23  ;;  %v1396_v31 = vadd.f32 %v1395_v28, %v3612_v3  ;;  %v1507_v34 = vadd.f32 %v1506_v22, %v1394_v25  ;;  %v1577_v50 = vmax.f32 %v1505_v37, 0.0 }
 0x1cc   : > { %v1397_v1 = vpop.f32.mrf.mxu0  ;;  %v1510_v33 = vpop.f32.mrf.mxu1 }
 0x1cd   : > { %v1509_v35 = vadd.f32 %v1508_v29, %v1396_v31  ;;  %v1398_v36 = vadd.f32 %v1397_v1, %v3609_v2  ;;  %1788 = vmatprep.mubr.bf16.mxu0 %v1606_v30  ;;  %v1578_v46 = vmax.f32 %v1507_v34, 0.0 }
 0x1ce   : > { %v1401_v38 = vpop.f32.mrf.mxu0  ;;  %v1514_v39 = vpop.f32.mrf.mxu1  ;;  %1789 = vmatmul.mubr.bf16.vlgmr.msra.gmra.mxu0 %v1605_v32 }
 0x1cf   : > { %v1511_v40 = vadd.f32 %v1510_v33, %v1398_v36  ;;  %v1579_v41 = vmax.f32 %v1509_v35, 0.0  ;;  %v1402_v51 = vadd.f32 %v1401_v38, %v3612_v3 }
 0x1d0   : > { %v1403_v42 = vpop.f32.mrf.mxu0  ;;  %v1516_v43 = vpop.f32.mrf.mxu1 }
 0x1d1   : > { %v1580_v48 = vmax.f32 %v1511_v40, 0.0  ;;  %v1404_v49 = vadd.f32 %v1403_v42, %v3609_v2  ;;  %v1607_v59 = vpack.c.bf16 %v1579_v41, %v1577_v50  ;;  %v1515_v62 = vadd.f32 %v1514_v39, %v1402_v51 }
 0x1d2   : > { %v1405_v56 = vpop.f32.mrf.mxu0  ;;  %v1518_v57 = vpop.f32.mrf.mxu1 }
 0x1d3   : > { %v1608_v58 = vpack.c.bf16 %v1580_v48, %v1578_v46  ;;  %v1406_v54 = vadd.f32 %v1405_v56, %v3612_v3  ;;  %v1517_v52 = vadd.f32 %v1516_v43, %v1404_v49  ;;  %v1581_v11 = vmax.f32 %v1515_v62, 0.0 }
 0x1d4   : > { %v1407_v55 = vpop.f32.mrf.mxu0  ;;  %v1520_v60 = vpop.f32.mrf.mxu1 }
 0x1d5   : > { %v1519_v53 = vadd.f32 %v1518_v57, %v1406_v54  ;;  %v1408_v61 = vadd.f32 %v1407_v55, %v3609_v2  ;;  %1796 = vmatprep.mubr.bf16.mxu0 %v1608_v58  ;;  %v1582_v8 = vmax.f32 %v1517_v52, 0.0 }
 0x1d6   : > { %v1411_v63 = vpop.f32.mrf.mxu0  ;;  %v1524_v0 = vpop.f32.mrf.mxu1  ;;  %1797 = vmatmul.mubr.bf16.gmra.mxu0 %v1607_v59 }
 0x1d7   : > { %v1521_v4 = vadd.f32 %v1520_v60, %v1408_v61  ;;  %v1583_v5 = vmax.f32 %v1519_v53, 0.0  ;;  %v1412_v12 = vadd.f32 %v1411_v63, %v3612_v3 }
 0x1d8   : > { %v1413_v6 = vpop.f32.mrf.mxu0  ;;  %v1526_v7 = vpop.f32.mrf.mxu1 }
 0x1d9   : > { %v1584_v9 = vmax.f32 %v1521_v4, 0.0  ;;  %v1414_v10 = vadd.f32 %v1413_v6, %v3609_v2  ;;  %v1609_v15 = vpack.c.bf16 %v1583_v5, %v1581_v11  ;;  %v1525_v21 = vadd.f32 %v1524_v0, %v1412_v12 }
 0x1da   : > { %v1415_v13 = vpop.f32.mrf.mxu0  ;;  %v1528_v14 = vpop.f32.mrf.mxu1 }
 0x1db   : > { %v1610_v44 = vpack.c.bf16 %v1584_v9, %v1582_v8  ;;  %v1416_v45 = vadd.f32 %v1415_v13, %v3612_v3  ;;  %v1527_v18 = vadd.f32 %v1526_v7, %v1414_v10  ;;  %v1585_v31 = vmax.f32 %v1525_v21, 0.0 }
 0x1dc   : > { %v1417_v16 = vpop.f32.mrf.mxu0  ;;  %v1530_v17 = vpop.f32.mrf.mxu1 }
 0x1dd   : > { %v1529_v19 = vadd.f32 %v1528_v14, %v1416_v45  ;;  %v1418_v20 = vadd.f32 %v1417_v16, %v3609_v2  ;;  %1804 = vmatprep.mubr.bf16.mxu0 %v1610_v44  ;;  %v1586_v28 = vmax.f32 %v1527_v18, 0.0 }
 0x1de   : > { %v1421_v22 = vpop.f32.mrf.mxu0  ;;  %v1534_v23 = vpop.f32.mrf.mxu1  ;;  %1805 = vmatmul.mubr.bf16.gmra.mxu0 %v1609_v15 }
 0x1df   : > { %v1531_v24 = vadd.f32 %v1530_v17, %v1418_v20  ;;  %v1587_v25 = vmax.f32 %v1529_v19, 0.0  ;;  %v1422_v32 = vadd.f32 %v1421_v22, %v3612_v3 }
 0x1e0   : > { %v1423_v26 = vpop.f32.mrf.mxu0  ;;  %v1536_v27 = vpop.f32.mrf.mxu1 }
 0x1e1   : > { %v1588_v29 = vmax.f32 %v1531_v24, 0.0  ;;  %v1424_v30 = vadd.f32 %v1423_v26, %v3609_v2  ;;  %v1611_v36 = vpack.c.bf16 %v1587_v25, %v1585_v31  ;;  %v1535_v42 = vadd.f32 %v1534_v23, %v1422_v32 }
 0x1e2   : > { %v1425_v1 = vpop.f32.mrf.mxu0  ;;  %v1538_v33 = vpop.f32.mrf.mxu1 }
 0x1e3   : > { %v1612_v34 = vpack.c.bf16 %v1588_v29, %v1586_v28  ;;  %v1426_v35 = vadd.f32 %v1425_v1, %v3612_v3  ;;  %v1537_v39 = vadd.f32 %v1536_v27, %v1424_v30  ;;  %v1589_v54 = vmax.f32 %v1535_v42, 0.0 }
 0x1e4   : > { %v1427_v37 = vpop.f32.mrf.mxu0  ;;  %v1540_v38 = vpop.f32.mrf.mxu1 }
 0x1e5   : > { %v1539_v40 = vadd.f32 %v1538_v33, %v1426_v35  ;;  %v1428_v41 = vadd.f32 %v1427_v37, %v3609_v2  ;;  %1812 = vmatprep.mubr.bf16.mxu0 %v1612_v34  ;;  %v1590_v56 = vmax.f32 %v1537_v39, 0.0 }
 0x1e6   : > { %v1431_v43 = vpop.f32.mrf.mxu0  ;;  %v1544_v46 = vpop.f32.mrf.mxu1  ;;  %1813 = vmatmul.mubr.bf16.gmra.mxu0 %v1611_v36 }
 0x1e7   : > { %v1541_v48 = vadd.f32 %v1540_v38, %v1428_v41  ;;  %v1591_v49 = vmax.f32 %v1539_v40, 0.0  ;;  %v1432_v59 = vadd.f32 %v1431_v43, %v3612_v3 }
 0x1e8   : > { %v1433_v50 = vpop.f32.mrf.mxu0  ;;  %v1546_v51 = vpop.f32.mrf.mxu1 }
 0x1e9   : > { %v1592_v57 = vmax.f32 %v1541_v48, 0.0  ;;  %v1434_v58 = vadd.f32 %v1433_v50, %v3609_v2  ;;  %v1613_v61 = vpack.c.bf16 %v1591_v49, %v1589_v54  ;;  %v1545_v6 = vadd.f32 %v1544_v46, %v1432_v59 }
 0x1ea   : > { %v1435_v55 = vpop.f32.mrf.mxu0  ;;  %v1548_v60 = vpop.f32.mrf.mxu1 }
 0x1eb   : > { %v1614_v52 = vpack.c.bf16 %v1592_v57, %v1590_v56  ;;  %v1436_v53 = vadd.f32 %v1435_v55, %v3612_v3  ;;  %v1547_v0 = vadd.f32 %v1546_v51, %v1434_v58  ;;  %v1593_v45 = vmax.f32 %v1545_v6, 0.0 }
 0x1ec   : > { %v1437_v62 = vpop.f32.mrf.mxu0  ;;  %v1550_v63 = vpop.f32.mrf.mxu1 }
 0x1ed   : > { %v1549_v4 = vadd.f32 %v1548_v60, %v1436_v53  ;;  %v1438_v5 = vadd.f32 %v1437_v62, %v3609_v2  ;;  %1820 = vmatprep.mubr.bf16.mxu0 %v1614_v52  ;;  %v1594_v13 = vmax.f32 %v1547_v0, 0.0  ;;  %v2996_v60 = vld [vmem:[%s3831_s7 + $0x10] sm:$0xff]   ;;  %v2997_v52 = vld [vmem:[%s3831_s7 + $0x8] sm:$0xff]   ;;  %v2998_v53 = vld [vmem:[%s3831_s7] sm:$0xff]  }
 0x1ee   : > { %v1441_v7 = vpop.f32.mrf.mxu0  ;;  %v1554_v8 = vpop.f32.mrf.mxu1  ;;  %1821 = vmatmul.mubr.bf16.gmra.mxu0 %v1613_v61  ;;  %v2999_v61 = vld [vmem:[%s3833_s9 + $0x18] sm:$0xff]  }
 0x1ef   : > { %v1551_v9 = vadd.f32 %v1550_v63, %v1438_v5  ;;  %v1595_v10 = vmax.f32 %v1549_v4, 0.0  ;;  %v1442_v15 = vadd.f32 %v1441_v7, %v3612_v3  ;;  %v3667_v4 = vld [vmem:[%s3830_s6] ss:$0 sm:$0xff] }
 0x1f0   : > { %v1443_v11 = vpop.f32.mrf.mxu0  ;;  %v1556_v12 = vpop.f32.mrf.mxu1 }
 0x1f1   : > { %v1596_v14 = vmax.f32 %v1551_v9, 0.0  ;;  %v1444_v44 = vadd.f32 %v1443_v11, %v3609_v2  ;;  %v1615_v20 = vpack.c.bf16 %v1595_v10, %v1593_v45  ;;  %v1555_v26 = vadd.f32 %v1554_v8, %v1442_v15 }
 0x1f2   : > { %v1445_v16 = vpop.f32.mrf.mxu0  ;;  %v1558_v17 = vpop.f32.mrf.mxu1 }
 0x1f3   : > { %v1616_v18 = vpack.c.bf16 %v1596_v14, %v1594_v13  ;;  %v1446_v19 = vadd.f32 %v1445_v16, %v3612_v3  ;;  %v1557_v23 = vadd.f32 %v1556_v12, %v1444_v44  ;;  %v1597_v35 = vmax.f32 %v1555_v26, 0.0 }
 0x1f4   : > { %v1447_v21 = vpop.f32.mrf.mxu0  ;;  %v1560_v22 = vpop.f32.mrf.mxu1 }
 0x1f5   : > { %v1559_v24 = vadd.f32 %v1558_v17, %v1446_v19  ;;  %v1448_v25 = vadd.f32 %v1447_v21, %v3609_v2  ;;  %1828 = vmatprep.mubr.bf16.mxu0 %v1616_v18  ;;  %v1598_v1 = vmax.f32 %v1557_v23, 0.0 }
 0x1f6   : > { %v1451_v27 = vpop.f32.mrf.mxu0  ;;  %v1564_v28 = vpop.f32.mrf.mxu1  ;;  %1829 = vmatmul.mubr.bf16.gmra.mxu0 %v1615_v20 }
 0x1f7   : > { %v1561_v29 = vadd.f32 %v1560_v22, %v1448_v25  ;;  %v1599_v30 = vmax.f32 %v1559_v24, 0.0  ;;  %v1452_v36 = vadd.f32 %v1451_v27, %v3612_v3 }
 0x1f8   : > { %v1453_v31 = vpop.f32.mrf.mxu0  ;;  %v1566_v32 = vpop.f32.mrf.mxu1 }
 0x1f9   : > { %v1600_v33 = vmax.f32 %v1561_v29, 0.0  ;;  %v1454_v34 = vadd.f32 %v1453_v31, %v3609_v2  ;;  %v1617_v41 = vpack.c.bf16 %v1599_v30, %v1597_v35  ;;  %v1565_v49 = vadd.f32 %v1564_v28, %v1452_v36 }
 0x1fa   : > { %v1455_v37 = vpop.f32.mrf.mxu0  ;;  %v1568_v38 = vpop.f32.mrf.mxu1 }
 0x1fb   : > { %v1618_v39 = vpack.c.bf16 %v1600_v33, %v1598_v1  ;;  %v1456_v40 = vadd.f32 %v1455_v37, %v3612_v3  ;;  %v1567_v43 = vadd.f32 %v1566_v32, %v1454_v34  ;;  %v1601_v54 = vmax.f32 %v1565_v49, 0.0  ;;  %v2994_v3 = vld [vmem:[%s3831_s7 + $0x20] sm:$0xff]  }
 0x1fc   : > { %v1457_v42 = vpop.f32.mrf.mxu0  ;;  %v1570_v50 = vpop.f32.mrf.mxu1  ;;  %2783 = vmatprep.subr.bf16.mxu1 %v2994_v3 }
 0x1fd   : > { %v1569_v46 = vadd.f32 %v1568_v38, %v1456_v40  ;;  %v1458_v48 = vadd.f32 %v1457_v42, %v3609_v2  ;;  %1836 = vmatprep.mubr.bf16.mxu0 %v1618_v39  ;;  %v1602_v57 = vmax.f32 %v1567_v43, 0.0  ;;  %2784 = vmatpush3.bf16.msra.mxu1 %v2994_v3  ;;  %v2995_v2 = vld [vmem:[%s3831_s7 + $0x18] sm:$0xff]  }
 0x1fe   : > { %1837 = vmatmul.mubr.bf16.gmra.mxu0 %v1617_v41  ;;  %2785 = vmatprep.subr.bf16.mxu1 %v2995_v2 }
 0x1ff   : > { %v1571_v51 = vadd.f32 %v1570_v50, %v1458_v48  ;;  %v1603_v56 = vmax.f32 %v1569_v46, 0.0 }
 0x201   : > { %v1604_v58 = vmax.f32 %v1571_v51, 0.0  ;;  %v1619_v55 = vpack.c.bf16 %v1603_v56, %v1601_v54  ;;  %2786 = vmatpush3.bf16.msra.mxu1 %v2995_v2 }
 0x202   : > { %2787 = vmatprep.subr.bf16.mxu1 %v2996_v60 }
 0x203   : > { %v1620_v59 = vpack.c.bf16 %v1604_v58, %v1602_v57 }
 0x205   : > { %1844 = vmatprep.mubr.bf16.mxu0 %v1620_v59  ;;  %2788 = vmatpush3.bf16.msra.mxu1 %v2996_v60 }
 0x206   : > { %1845 = vmatmul.mubr.bf16.gmra.mxu0 %v1619_v55  ;;  %2789 = vmatprep.subr.bf16.mxu1 %v2997_v52 }
 0x209   : > { %2790 = vmatpush3.bf16.msra.mxu1 %v2997_v52 }
 0x20a   : > { %2791 = vmatprep.subr.bf16.mxu1 %v2998_v53 }
 0x20d   : > { %2792 = vmatpush3.bf16.msra.mxu1 %v2998_v53 }
 0x20e   : > { %2809 = vmatprep.subr.bf16.mxu1 %v2999_v61 }
 0x28e   : > { %v2701_v62 = vpop.f32.mrf.mxu0 }
 0x290   : > { %v2702_v63 = vpop.f32.mrf.mxu0 }
 0x291   : > { %v2703_v0 = vadd.f32 %v2702_v63, %v2701_v62 }
 0x292   : > { %v2704_v5 = vpop.f32.mrf.mxu0 }
 0x293   : > { %v1791_v7 = vadd.f32 %v2703_v0, %v3667_v4 }
 0x294   : > { %v2705_v6 = vpop.f32.mrf.mxu0 }
 0x295   : > { %v2706_v8 = vadd.f32 %v2705_v6, %v2704_v5  ;;  %v1853_v12 = vmax.f32 %v1791_v7, 0.0 }
 0x296   : > { %v2707_v9 = vpop.f32.mrf.mxu0 }
 0x297   : > { %v1794_v10 = vadd.f32 %v2706_v8, %v3667_v4 }
 0x298   : > { %v2708_v11 = vpop.f32.mrf.mxu0 }
 0x299   : > { %v1854_v13 = vmax.f32 %v1794_v10, 0.0  ;;  %v2709_v14 = vadd.f32 %v2708_v11, %v2707_v9 }
 0x29a   : > { %v2710_v44 = vpop.f32.mrf.mxu0 }
 0x29b   : > { %v1869_v45 = vpack.c.bf16 %v1854_v13, %v1853_v12  ;;  %v1799_v16 = vadd.f32 %v2709_v14, %v3667_v4 }
 0x29c   : > { %v2711_v15 = vpop.f32.mrf.mxu0 }
 0x29d   : > { %v2712_v17 = vadd.f32 %v2711_v15, %v2710_v44  ;;  %2793 = vmatprep.mubr.bf16.mxu1 %v1869_v45  ;;  %v1855_v21 = vmax.f32 %v1799_v16, 0.0 }
 0x29e   : > { %v2713_v18 = vpop.f32.mrf.mxu0 }
 0x29f   : > { %v1802_v19 = vadd.f32 %v2712_v17, %v3667_v4 }
 0x2a0   : > { %v2714_v20 = vpop.f32.mrf.mxu0 }
 0x2a1   : > { %v1856_v22 = vmax.f32 %v1802_v19, 0.0  ;;  %v2715_v23 = vadd.f32 %v2714_v20, %v2713_v18 }
 0x2a2   : > { %v2716_v24 = vpop.f32.mrf.mxu0 }
 0x2a3   : > { %v1870_v25 = vpack.c.bf16 %v1856_v22, %v1855_v21  ;;  %v1807_v27 = vadd.f32 %v2715_v23, %v3667_v4 }
 0x2a4   : > { %v2717_v26 = vpop.f32.mrf.mxu0 }
 0x2a5   : > { %v2718_v28 = vadd.f32 %v2717_v26, %v2716_v24  ;;  %2794 = vmatmul.mubr.bf16.vlgmr.msra.gmra.mxu1 %v1870_v25  ;;  %v1857_v32 = vmax.f32 %v1807_v27, 0.0  ;;  %v3000_v26 = vld [vmem:[%s3833_s9 + $0x10] sm:$0xff]   ;;  %v3001_v27 = vld [vmem:[%s3833_s9 + $0x8] sm:$0xff]  }
 0x2a6   : > { %v2719_v29 = vpop.f32.mrf.mxu0  ;;  %2810 = vmatpush3.bf16.msra.mxu1 %v2999_v61 }
 0x2a7   : > { %v1810_v30 = vadd.f32 %v2718_v28, %v3667_v4  ;;  %2811 = vmatprep.subr.bf16.mxu1 %v3000_v26 }
 0x2a8   : > { %v2720_v31 = vpop.f32.mrf.mxu0 }
 0x2a9   : > { %v1858_v1 = vmax.f32 %v1810_v30, 0.0  ;;  %v2721_v33 = vadd.f32 %v2720_v31, %v2719_v29  ;;  %v2644_v30 = vld [vmem:[%s3832_s8] ss:$0 sm:$0xff] }
 0x2aa   : > { %v2722_v34 = vpop.f32.mrf.mxu0  ;;  %2812 = vmatpush3.bf16.msra.mxu1 %v3000_v26 }
 0x2ab   : > { %v1871_v35 = vpack.c.bf16 %v1858_v1, %v1857_v32  ;;  %v1815_v37 = vadd.f32 %v2721_v33, %v3667_v4  ;;  %2813 = vmatprep.subr.bf16.mxu1 %v3001_v27 }
 0x2ac   : > { %v2723_v36 = vpop.f32.mrf.mxu0 }
 0x2ad   : > { %v2724_v38 = vadd.f32 %v2723_v36, %v2722_v34  ;;  %2797 = vmatprep.mubr.bf16.mxu1 %v1871_v35  ;;  %v1859_v42 = vmax.f32 %v1815_v37, 0.0 }
 0x2ae   : > { %v2725_v39 = vpop.f32.mrf.mxu0  ;;  %2814 = vmatpush3.bf16.msra.mxu1 %v3001_v27 }
 0x2af   : > { %v1818_v40 = vadd.f32 %v2724_v38, %v3667_v4 }
 0x2b0   : > { %v2726_v41 = vpop.f32.mrf.mxu0 }
 0x2b1   : > { %v1860_v43 = vmax.f32 %v1818_v40, 0.0  ;;  %v2727_v46 = vadd.f32 %v2726_v41, %v2725_v39 }
 0x2b2   : > { %v2728_v48 = vpop.f32.mrf.mxu0 }
 0x2b3   : > { %v1872_v49 = vpack.c.bf16 %v1860_v43, %v1859_v42  ;;  %v1823_v51 = vadd.f32 %v2727_v46, %v3667_v4 }
 0x2b4   : > { %v2729_v50 = vpop.f32.mrf.mxu0 }
 0x2b5   : > { %v2730_v56 = vadd.f32 %v2729_v50, %v2728_v48  ;;  %2798 = vmatmul.mubr.bf16.gmra.mxu1 %v1872_v49  ;;  %v1861_v59 = vmax.f32 %v1823_v51, 0.0 }
 0x2b6   : > { %v2731_v57 = vpop.f32.mrf.mxu0 }
 0x2b7   : > { %v1826_v58 = vadd.f32 %v2730_v56, %v3667_v4 }
 0x2b8   : > { %v2732_v54 = vpop.f32.mrf.mxu0 }
 0x2b9   : > { %v1862_v55 = vmax.f32 %v1826_v58, 0.0  ;;  %v2733_v3 = vadd.f32 %v2732_v54, %v2731_v57 }
 0x2ba   : > { %v2734_v2 = vpop.f32.mrf.mxu0 }
 0x2bb   : > { %v1873_v60 = vpack.c.bf16 %v1862_v55, %v1861_v59  ;;  %v1831_v53 = vadd.f32 %v2733_v3, %v3667_v4 }
 0x2bc   : > { %v2735_v52 = vpop.f32.mrf.mxu0 }
 0x2bd   : > { %v2736_v61 = vadd.f32 %v2735_v52, %v2734_v2  ;;  %2801 = vmatprep.mubr.bf16.mxu1 %v1873_v60  ;;  %v1863_v5 = vmax.f32 %v1831_v53, 0.0 }
 0x2be   : > { %v2737_v62 = vpop.f32.mrf.mxu0 }
 0x2bf   : > { %v1834_v63 = vadd.f32 %v2736_v61, %v3667_v4 }
 0x2c0   : > { %v2738_v0 = vpop.f32.mrf.mxu0 }
 0x2c1   : > { %v1864_v6 = vmax.f32 %v1834_v63, 0.0  ;;  %v2739_v7 = vadd.f32 %v2738_v0, %v2737_v62 }
 0x2c2   : > { %v2740_v8 = vpop.f32.mrf.mxu0 }
 0x2c3   : > { %v1874_v9 = vpack.c.bf16 %v1864_v6, %v1863_v5  ;;  %v1839_v11 = vadd.f32 %v2739_v7, %v3667_v4 }
 0x2c4   : > { %v2741_v10 = vpop.f32.mrf.mxu0 }
 0x2c5   : > { %v2742_v12 = vadd.f32 %v2741_v10, %v2740_v8  ;;  %2802 = vmatmul.mubr.bf16.gmra.mxu1 %v1874_v9  ;;  %v1865_v45 = vmax.f32 %v1839_v11, 0.0 }
 0x2c6   : > { %v2743_v13 = vpop.f32.mrf.mxu0 }
 0x2c7   : > { %v1842_v14 = vadd.f32 %v2742_v12, %v3667_v4 }
 0x2c8   : > { %v2744_v44 = vpop.f32.mrf.mxu0 }
 0x2c9   : > { %v1866_v15 = vmax.f32 %v1842_v14, 0.0  ;;  %v2745_v16 = vadd.f32 %v2744_v44, %v2743_v13 }
 0x2ca   : > { %v2746_v17 = vpop.f32.mrf.mxu0 }
 0x2cb   : > { %v1875_v18 = vpack.c.bf16 %v1866_v15, %v1865_v45  ;;  %v1847_v20 = vadd.f32 %v2745_v16, %v3667_v4 }
 0x2cc   : > { %v2747_v19 = vpop.f32.mrf.mxu0 }
 0x2cd   : > { %v2748_v21 = vadd.f32 %v2747_v19, %v2746_v17  ;;  %2805 = vmatprep.mubr.bf16.mxu1 %v1875_v18  ;;  %v1867_v23 = vmax.f32 %v1847_v20, 0.0 }
 0x2cf   : > { %v1850_v22 = vadd.f32 %v2748_v21, %v3667_v4  ;;  %v3002_v4 = vld [vmem:[%s3833_s9] sm:$0xff]  }
 0x2d0   : > { %2815 = vmatprep.subr.bf16.mxu1 %v3002_v4 }
 0x2d1   : > { %v1868_v24 = vmax.f32 %v1850_v22, 0.0  ;;  %2816 = vmatpush3.bf16.msra.mxu1 %v3002_v4 }
 0x2d3   : > { %v1876_v25 = vpack.c.bf16 %v1868_v24, %v1867_v23  ;;  %v2245_v23 = vld [vmem:[%s3835_s11] sm:$0x1] }
 0x2d4   : > { %v2246_v24 = vunpack.c.l.bf16 %v2245_v23 }
 0x2d5   : > { %2806 = vmatmul.mubr.bf16.gmra.mxu1 %v1876_v25  ;;  %v3711_v25 = vld [vmem:[%s3834_s10] ss:$0 sm:$0xff] }
 0x2d6   : > { %v3715_v4 = vrot.slane %v2246_v24, %v3514_v47 }
 0x365   : > { %v2795_v28 = vpop.f32.mrf.mxu1 }
 0x366   : > { %v1991_v33 = vadd.f32 %v2795_v28, %v2644_v30 }
 0x367   : > { %v1982_v29 = vpop.f32.mrf.mxu1 }
 0x368   : > { %v1983_v32 = vadd.f32 %v2644_v30, %v1982_v29  ;;  %v2047_v39 = vmax.f32 %v1991_v33, 0.0 }
 0x369   : > { %v2796_v31 = vpop.f32.mrf.mxu1 }
 0x36a   : > { %v1994_v1 = vadd.f32 %v2796_v31, %v2644_v30  ;;  %v2045_v37 = vmax.f32 %v1983_v32, 0.0 }
 0x36b   : > { %v1985_v34 = vpop.f32.mrf.mxu1 }
 0x36c   : > { %v1986_v35 = vadd.f32 %v2644_v30, %v1985_v34  ;;  %v2048_v36 = vmax.f32 %v1994_v1, 0.0 }
 0x36e   : > { %v2046_v38 = vmax.f32 %v1986_v35, 0.0  ;;  %v2062_v41 = vpack.c.bf16 %v2048_v36, %v2047_v39 }
 0x370   : > { %v2061_v40 = vpack.c.bf16 %v2046_v38, %v2045_v37 }
 0x372   : > { %2817 = vmatprep.mubr.msk.bf16.mxu1 %vm604_vm0, %v2061_v40 }
 0x373   : > { %2818 = vmatmul.mubr.msk.bf16.vlgmr.msra.gmra.mxu1 %vm604_vm0, %v2062_v41 }
 0x375   : > { %v2799_v42 = vpop.f32.mrf.mxu1 }
 0x376   : > { %v2007_v50 = vadd.f32 %v2799_v42, %v2644_v30 }
 0x377   : > { %v1998_v43 = vpop.f32.mrf.mxu1 }
 0x378   : > { %v1999_v48 = vadd.f32 %v2644_v30, %v1998_v43  ;;  %v2051_v59 = vmax.f32 %v2007_v50, 0.0 }
 0x379   : > { %v2800_v46 = vpop.f32.mrf.mxu1 }
 0x37a   : > { %v2010_v49 = vadd.f32 %v2800_v46, %v2644_v30  ;;  %v2049_v58 = vmax.f32 %v1999_v48, 0.0 }
 0x37b   : > { %v2001_v51 = vpop.f32.mrf.mxu1 }
 0x37c   : > { %v2002_v56 = vadd.f32 %v2644_v30, %v2001_v51  ;;  %v2052_v57 = vmax.f32 %v2010_v49, 0.0 }
 0x37e   : > { %v2050_v54 = vmax.f32 %v2002_v56, 0.0  ;;  %v2064_v3 = vpack.c.bf16 %v2052_v57, %v2051_v59 }
 0x380   : > { %v2063_v55 = vpack.c.bf16 %v2050_v54, %v2049_v58 }
 0x382   : > { %2821 = vmatprep.mubr.msk.bf16.mxu1 %vm604_vm0, %v2063_v55 }
 0x383   : > { %2822 = vmatmul.mubr.msk.bf16.gmra.mxu1 %vm604_vm0, %v2064_v3 }
 0x385   : > { %v2803_v2 = vpop.f32.mrf.mxu1 }
 0x386   : > { %v2023_v62 = vadd.f32 %v2803_v2, %v2644_v30 }
 0x387   : > { %v2014_v60 = vpop.f32.mrf.mxu1 }
 0x388   : > { %v2015_v53 = vadd.f32 %v2644_v30, %v2014_v60  ;;  %v2055_v8 = vmax.f32 %v2023_v62, 0.0 }
 0x389   : > { %v2804_v52 = vpop.f32.mrf.mxu1 }
 0x38a   : > { %v2026_v61 = vadd.f32 %v2804_v52, %v2644_v30  ;;  %v2053_v6 = vmax.f32 %v2015_v53, 0.0 }
 0x38b   : > { %v2017_v63 = vpop.f32.mrf.mxu1 }
 0x38c   : > { %v2018_v0 = vadd.f32 %v2644_v30, %v2017_v63  ;;  %v2056_v5 = vmax.f32 %v2026_v61, 0.0 }
 0x38e   : > { %v2054_v7 = vmax.f32 %v2018_v0, 0.0  ;;  %v2066_v10 = vpack.c.bf16 %v2056_v5, %v2055_v8 }
 0x390   : > { %v2065_v9 = vpack.c.bf16 %v2054_v7, %v2053_v6 }
 0x392   : > { %2825 = vmatprep.mubr.msk.bf16.mxu1 %vm604_vm0, %v2065_v9 }
 0x393   : > { %2826 = vmatmul.mubr.msk.bf16.gmra.mxu1 %vm604_vm0, %v2066_v10 }
 0x395   : > { %v2807_v11 = vpop.f32.mrf.mxu1 }
 0x396   : > { %v2039_v45 = vadd.f32 %v2807_v11, %v2644_v30 }
 0x397   : > { %v2030_v12 = vpop.f32.mrf.mxu1 }
 0x398   : > { %v2031_v14 = vadd.f32 %v2644_v30, %v2030_v12  ;;  %v2059_v20 = vmax.f32 %v2039_v45, 0.0 }
 0x399   : > { %v2808_v13 = vpop.f32.mrf.mxu1 }
 0x39a   : > { %v2042_v44 = vadd.f32 %v2808_v13, %v2644_v30  ;;  %v2057_v18 = vmax.f32 %v2031_v14, 0.0 }
 0x39b   : > { %v2033_v15 = vpop.f32.mrf.mxu1 }
 0x39c   : > { %v2034_v16 = vadd.f32 %v2644_v30, %v2033_v15  ;;  %v2060_v17 = vmax.f32 %v2042_v44, 0.0 }
 0x39e   : > { %v2058_v19 = vmax.f32 %v2034_v16, 0.0  ;;  %v2068_v22 = vpack.c.bf16 %v2060_v17, %v2059_v20 }
 0x3a0   : > { %v2067_v21 = vpack.c.bf16 %v2058_v19, %v2057_v18 }
 0x3a2   : > { %2829 = vmatprep.mubr.msk.bf16.mxu1 %vm604_vm0, %v2067_v21 }
 0x3a3   : > { %2830 = vmatmul.mubr.msk.bf16.gmra.mxu1 %vm604_vm0, %v2068_v22 }
 0x433   : > { %v2819_v26 = vpop.f32.mrf.mxu1 }
 0x434   : > { %v2175_v27 = vadd.f32 %v2819_v26, %v3711_v25 }
 0x435   : > { %v2166_v28 = vpop.f32.mrf.mxu1 }
 0x436   : > { %v2231_v29 = vmax.f32 %v2175_v27, 0.0  ;;  %v2167_v30 = vadd.f32 %v3711_v25, %v2166_v28 }
 0x437   : > { %v2820_v31 = vpop.f32.mrf.mxu1 }
 0x438   : > { %v2229_v32 = vmax.f32 %v2167_v30, 0.0  ;;  %v2178_v1 = vadd.f32 %v2820_v31, %v3711_v25  ;;  %v2253_v33 = vmul.f32 %v3715_v4, %v2231_v29 }
 0x439   : > { %v2169_v34 = vpop.f32.mrf.mxu1 }
 0x43a   : > { %v2232_v35 = vmax.f32 %v2178_v1, 0.0  ;;  %v2170_v36 = vadd.f32 %v3711_v25, %v2169_v34  ;;  %v2274_v37 = vsel %vm2267_vm1, %v2253_v33, 0.0  ;;  %v2251_v47 = vmul.f32 %v3715_v4, %v2229_v32 }
 0x43b   : > { %2275 = vadd.xlane.f32.xlu1 %v2274_v37 }
 0x43c   : > { %v2230_v38 = vmax.f32 %v2170_v36, 0.0  ;;  %v2268_v39 = vsel %vm2267_vm1, %v2251_v47, 0.0  ;;  %v2254_v40 = vmul.f32 %v3715_v4, %v2232_v35 }
 0x43d   : > { %2269 = vadd.xlane.f32.xlu0 %v2268_v39 }
 0x43e   : > { %v2277_v41 = vsel %vm2267_vm1, %v2254_v40, 0.0  ;;  %v2252_v42 = vmul.f32 %v3715_v4, %v2230_v38 }
 0x43f   : > { %2278 = vadd.xlane.f32.xlu1 %v2277_v41  ;;  %v3764_v41 = vld [vmem:[#allocation2] ss:$0 sm:$0xff] }
 0x440   : > { %v2271_v43 = vsel %vm2267_vm1, %v2252_v42, 0.0 }
 0x441   : > { %2272 = vadd.xlane.f32.xlu0 %v2271_v43 }
 0x443   : > { %v2823_v46 = vpop.f32.mrf.mxu1 }
 0x444   : > { %v2191_v48 = vadd.f32 %v2823_v46, %v3711_v25 }
 0x445   : > { %v2182_v49 = vpop.f32.mrf.mxu1 }
 0x446   : > { %v2235_v50 = vmax.f32 %v2191_v48, 0.0  ;;  %v2183_v51 = vadd.f32 %v3711_v25, %v2182_v49 }
 0x447   : > { %v2824_v56 = vpop.f32.mrf.mxu1 }
 0x448   : > { %v2233_v57 = vmax.f32 %v2183_v51, 0.0  ;;  %v2194_v58 = vadd.f32 %v2824_v56, %v3711_v25  ;;  %v2257_v54 = vmul.f32 %v3715_v4, %v2235_v50 }
 0x449   : > { %v2185_v59 = vpop.f32.mrf.mxu1 }
 0x44a   : > { %v2236_v55 = vmax.f32 %v2194_v58, 0.0  ;;  %v2186_v3 = vadd.f32 %v3711_v25, %v2185_v59  ;;  %v2286_v2 = vsel %vm2267_vm1, %v2257_v54, 0.0  ;;  %v2255_v60 = vmul.f32 %v3715_v4, %v2233_v57 }
 0x44b   : > { %2287 = vadd.xlane.f32.xlu0 %v2286_v2 }
 0x44c   : > { %v2234_v52 = vmax.f32 %v2186_v3, 0.0  ;;  %v2258_v53 = vmul.f32 %v3715_v4, %v2236_v55  ;;  %v2280_v62 = vsel %vm2267_vm1, %v2255_v60, 0.0 }
 0x44e   : > { %v2289_v61 = vsel %vm2267_vm1, %v2258_v53, 0.0  ;;  %v2256_v63 = vmul.f32 %v3715_v4, %v2234_v52 }
 0x44f   : > { %2290 = vadd.xlane.f32.xlu1 %v2289_v61  ;;  %2281 = vadd.xlane.f32.xlu0 %v2280_v62 }
 0x450   : > { %v2283_v0 = vsel %vm2267_vm1, %v2256_v63, 0.0 }
 0x453   : > { %v2827_v5 = vpop.f32.mrf.mxu1  ;;  %2284 = vadd.xlane.f32.xlu1 %v2283_v0 }
 0x454   : > { %v2207_v6 = vadd.f32 %v2827_v5, %v3711_v25 }
 0x455   : > { %v2198_v7 = vpop.f32.mrf.mxu1 }
 0x456   : > { %v2239_v8 = vmax.f32 %v2207_v6, 0.0  ;;  %v2199_v9 = vadd.f32 %v3711_v25, %v2198_v7 }
 0x457   : > { %v2828_v10 = vpop.f32.mrf.mxu1 }
 0x458   : > { %v2237_v11 = vmax.f32 %v2199_v9, 0.0  ;;  %v2210_v12 = vadd.f32 %v2828_v10, %v3711_v25  ;;  %v2261_v13 = vmul.f32 %v3715_v4, %v2239_v8 }
 0x459   : > { %v2201_v14 = vpop.f32.mrf.mxu1 }
 0x45a   : > { %v2240_v44 = vmax.f32 %v2210_v12, 0.0  ;;  %v2202_v45 = vadd.f32 %v3711_v25, %v2201_v14  ;;  %v2298_v15 = vsel %vm2267_vm1, %v2261_v13, 0.0  ;;  %v2259_v16 = vmul.f32 %v3715_v4, %v2237_v11 }
 0x45b   : > { %2299 = vadd.xlane.f32.xlu0 %v2298_v15 }
 0x45c   : > { %v2238_v17 = vmax.f32 %v2202_v45, 0.0  ;;  %v2262_v18 = vmul.f32 %v3715_v4, %v2240_v44  ;;  %v2292_v20 = vsel %vm2267_vm1, %v2259_v16, 0.0 }
 0x45e   : > { %v2301_v19 = vsel %vm2267_vm1, %v2262_v18, 0.0  ;;  %v2260_v21 = vmul.f32 %v3715_v4, %v2238_v17 }
 0x45f   : > { %2302 = vadd.xlane.f32.xlu1 %v2301_v19  ;;  %2293 = vadd.xlane.f32.xlu0 %v2292_v20 }
 0x460   : > { %v2295_v22 = vsel %vm2267_vm1, %v2260_v21, 0.0 }
 0x463   : > { %v2831_v23 = vpop.f32.mrf.mxu1  ;;  %2296 = vadd.xlane.f32.xlu1 %v2295_v22 }
 0x464   : > { %v2223_v24 = vadd.f32 %v2831_v23, %v3711_v25 }
 0x465   : > { %v2214_v26 = vpop.f32.mrf.mxu1 }
 0x466   : > { %v2215_v27 = vadd.f32 %v3711_v25, %v2214_v26  ;;  %v2243_v29 = vmax.f32 %v2223_v24, 0.0 }
 0x467   : > { %v2832_v28 = vpop.f32.mrf.mxu1 }
 0x468   : > { %v2241_v30 = vmax.f32 %v2215_v27, 0.0  ;;  %v2226_v31 = vadd.f32 %v2832_v28, %v3711_v25  ;;  %v2265_v37 = vmul.f32 %v3715_v4, %v2243_v29 }
 0x469   : > { %v2217_v32 = vpop.f32.mrf.mxu1 }
 0x46a   : > { %v2218_v1 = vadd.f32 %v3711_v25, %v2217_v32  ;;  %v2263_v33 = vmul.f32 %v3715_v4, %v2241_v30  ;;  %v2244_v34 = vmax.f32 %v2226_v31, 0.0  ;;  %v2310_v39 = vsel %vm2267_vm1, %v2265_v37, 0.0 }
 0x46c   : > { %v2242_v35 = vmax.f32 %v2218_v1, 0.0  ;;  %v2304_v36 = vsel %vm2267_vm1, %v2263_v33, 0.0  ;;  %v2266_v40 = vmul.f32 %v3715_v4, %v2244_v34 }
 0x46d   : > { %2305 = vadd.xlane.f32.xlu0 %v2304_v36 }
 0x46e   : > { %v2264_v47 = vmul.f32 %v3715_v4, %v2242_v35  ;;  %v2313_v25 = vsel %vm2267_vm1, %v2266_v40, 0.0 }
 0x470   : > { %v2307_v38 = vsel %vm2267_vm1, %v2264_v47, 0.0 }
 0x471   : > { %2308 = vadd.xlane.f32.xlu1 %v2307_v38  ;;  %2311 = vadd.xlane.f32.xlu0 %v2310_v39 }
 0x475   : > { %2314 = vadd.xlane.f32.xlu1 %v2313_v25 }
 0x4c4   : > { %v2276_v42 = vpop.xlane.xlu1 %2275 }
 0x4c5   : > { %v2325_v43 = vadd.f32 %v3764_v41, %v2276_v42 }
 0x4c6   : > { %v2270_v46 = vpop.xlane.xlu0 %2269 }
 0x4c7   : > { %v2669_v48 = vmul.f32 -1.442695, %v2325_v43  ;;  %v2323_v49 = vadd.f32 %v3764_v41, %v2270_v46 }
 0x4c8   : > { %v2279_v50 = vpop.xlane.xlu1 %2278 }
 0x4c9   : > { %3003 = vpow2.f32 %v2669_v48  ;;  %v2667_v51 = vmul.f32 -1.442695, %v2323_v49  ;;  %v2326_v56 = vadd.f32 %v3764_v41, %v2279_v50 }
 0x4ca   : > { %v2273_v4 = vpop.xlane.xlu0 %2272 }
 0x4cb   : > { %3005 = vpow2.f32 %v2667_v51  ;;  %v2670_v57 = vmul.f32 -1.442695, %v2326_v56  ;;  %v2324_v58 = vadd.f32 %v3764_v41, %v2273_v4 }
 0x4cd   : > { %3007 = vpow2.f32 %v2670_v57  ;;  %v2668_v54 = vmul.f32 -1.442695, %v2324_v58 }
 0x4cf   : > { %3009 = vpow2.f32 %v2668_v54 }
 0x4d4   : > { %v2288_v59 = vpop.xlane.xlu0 %2287 }
 0x4d5   : > { %v2329_v55 = vadd.f32 %v3764_v41, %v2288_v59 }
 0x4d6   : > { %v3004_v3 = vpop.eup %3003 }
 0x4d7   : > { %v2389_v2 = vadd.f32 1.0, %v3004_v3  ;;  %v2673_v60 = vmul.f32 -1.442695, %v2329_v55 }
 0x4d8   : > { %v3006_v52 = vpop.eup %3005  ;;  %v2291_v53 = vpop.xlane.xlu1 %2290 }
 0x4d9   : > { %v2282_v61 = vpop.xlane.xlu0 %2281  ;;  %3011 = vrcp.f32 %v2389_v2  ;;  %v2387_v62 = vadd.f32 1.0, %v3006_v52  ;;  %v2330_v63 = vadd.f32 %v3764_v41, %v2291_v53 }
 0x4da   : > { %v2327_v0 = vadd.f32 %v3764_v41, %v2282_v61  ;;  %v3008_v5 = vpop.eup %3007  ;;  %3013 = vpow2.f32 %v2673_v60 }
 0x4db   : > { %3015 = vrcp.f32 %v2387_v62  ;;  %v2390_v6 = vadd.f32 1.0, %v3008_v5  ;;  %v2674_v7 = vmul.f32 -1.442695, %v2330_v63 }
 0x4dc   : > { %v3010_v8 = vpop.eup %3009  ;;  %v2671_v9 = vmul.f32 -1.442695, %v2327_v0  ;;  %v2285_v10 = vpop.xlane.xlu1 %2284 }
 0x4dd   : > { %3017 = vrcp.f32 %v2390_v6  ;;  %v2388_v11 = vadd.f32 1.0, %v3010_v8  ;;  %v2328_v12 = vadd.f32 %v3764_v41, %v2285_v10 }
 0x4de   : > { %3019 = vpow2.f32 %v2674_v7 }
 0x4df   : > { %3021 = vrcp.f32 %v2388_v11  ;;  %v2672_v13 = vmul.f32 -1.442695, %v2328_v12 }
 0x4e0   : > { %3023 = vpow2.f32 %v2671_v9 }
 0x4e1   : > { %3025 = vpow2.f32 %v2672_v13 }
 0x4e4   : > { %v2300_v14 = vpop.xlane.xlu0 %2299 }
 0x4e5   : > { %v2333_v44 = vadd.f32 %v3764_v41, %v2300_v14 }
 0x4e6   : > { %v3012_v45 = vpop.eup %3011 }
 0x4e7   : > { %v3014_v15 = vpop.eup %3013  ;;  %2438 = vst.msk [vmem:[%s3779_s16 + $0x10] sm:$0xff] %vm2435_vm2, %v3012_v45  ;;  %v2677_v16 = vmul.f32 -1.442695, %v2333_v44 }
 0x4e8   : > { %v3016_v17 = vpop.eup %3015  ;;  %v2393_v18 = vadd.f32 1.0, %v3014_v15  ;;  %v2303_v19 = vpop.xlane.xlu1 %2302 }
 0x4e9   : > { %v2294_v20 = vpop.xlane.xlu0 %2293  ;;  %2436 = vst.msk [vmem:[%s3779_s16] sm:$0xff] %vm2435_vm2, %v3016_v17  ;;  %3027 = vpow2.f32 %v2677_v16  ;;  %v2334_v21 = vadd.f32 %v3764_v41, %v2303_v19 }
 0x4ea   : > { %v2331_v22 = vadd.f32 %v3764_v41, %v2294_v20  ;;  %v3018_v23 = vpop.eup %3017  ;;  %3029 = vrcp.f32 %v2393_v18 }
 0x4eb   : > { %v3020_v24 = vpop.eup %3019  ;;  %2439 = vst.msk [vmem:[%s3779_s16 + $0x18] sm:$0xff] %vm2435_vm2, %v3018_v23  ;;  %v2678_v26 = vmul.f32 -1.442695, %v2334_v21 }
 0x4ec   : > { %v2675_v27 = vmul.f32 -1.442695, %v2331_v22  ;;  %v3022_v28 = vpop.eup %3021  ;;  %v2394_v29 = vadd.f32 1.0, %v3020_v24  ;;  %v2297_v30 = vpop.xlane.xlu1 %2296 }
 0x4ed   : > { %v3024_v31 = vpop.eup %3023  ;;  %2437 = vst.msk [vmem:[%s3779_s16 + $0x8] sm:$0xff] %vm2435_vm2, %v3022_v28  ;;  %3031 = vpow2.f32 %v2678_v26  ;;  %v2332_v32 = vadd.f32 %v3764_v41, %v2297_v30 }
 0x4ee   : > { %v3026_v1 = vpop.eup %3025  ;;  %3033 = vrcp.f32 %v2394_v29  ;;  %v2391_v33 = vadd.f32 1.0, %v3024_v31 }
 0x4ef   : > { %v2392_v34 = vadd.f32 1.0, %v3026_v1  ;;  %3035 = vpow2.f32 %v2675_v27  ;;  %v2676_v35 = vmul.f32 -1.442695, %v2332_v32 }
 0x4f0   : > { %3037 = vrcp.f32 %v2391_v33 }
 0x4f1   : > { %3039 = vrcp.f32 %v2392_v34 }
 0x4f2   : > { %3041 = vpow2.f32 %v2676_v35 }
 0x4f6   : > { %v3028_v36 = vpop.eup %3027  ;;  %v2306_v37 = vpop.xlane.xlu0 %2305 }
 0x4f7   : > { %v3030_v47 = vpop.eup %3029  ;;  %v2397_v38 = vadd.f32 1.0, %v3028_v36  ;;  %v2335_v39 = vadd.f32 %v3764_v41, %v2306_v37 }
 0x4f8   : > { %2442 = vst.msk [vmem:[%s3779_s16 + $0x30] sm:$0xff] %vm2435_vm2, %v3030_v47 }
 0x4f9   : > { %3043 = vrcp.f32 %v2397_v38  ;;  %v2679_v40 = vmul.f32 -1.442695, %v2335_v39 }
 0x4fa   : > { %v3032_v25 = vpop.eup %3031  ;;  %v2309_v42 = vpop.xlane.xlu1 %2308 }
 0x4fb   : > { %v2312_v43 = vpop.xlane.xlu0 %2311  ;;  %v3034_v46 = vpop.eup %3033  ;;  %v2398_v48 = vadd.f32 1.0, %v3032_v25  ;;  %3045 = vpow2.f32 %v2679_v40  ;;  %v2336_v49 = vadd.f32 %v3764_v41, %v2309_v42 }
 0x4fc   : > { %v2337_v50 = vadd.f32 %v3764_v41, %v2312_v43  ;;  %v3036_v51 = vpop.eup %3035  ;;  %2443 = vst.msk [vmem:[%s3779_s16 + $0x38] sm:$0xff] %vm2435_vm2, %v3034_v46 }
 0x4fd   : > { %v3038_v56 = vpop.eup %3037  ;;  %3047 = vrcp.f32 %v2398_v48  ;;  %v2395_v4 = vadd.f32 1.0, %v3036_v51  ;;  %v2680_v57 = vmul.f32 -1.442695, %v2336_v49 }
 0x4fe   : > { %v2681_v58 = vmul.f32 -1.442695, %v2337_v50  ;;  %v3040_v54 = vpop.eup %3039  ;;  %2440 = vst.msk [vmem:[%s3779_s16 + $0x20] sm:$0xff] %vm2435_vm2, %v3038_v56  ;;  %v2315_v59 = vpop.xlane.xlu1 %2314 }
 0x4ff   : > { %v3042_v55 = vpop.eup %3041  ;;  %2441 = vst.msk [vmem:[%s3779_s16 + $0x28] sm:$0xff] %vm2435_vm2, %v3040_v54  ;;  %3049 = vrcp.f32 %v2395_v4  ;;  %v2338_v3 = vadd.f32 %v3764_v41, %v2315_v59 }
 0x500   : > { %v2396_v2 = vadd.f32 1.0, %v3042_v55  ;;  %3051 = vpow2.f32 %v2680_v57 }
 0x501   : > { %3053 = vpow2.f32 %v2681_v58  ;;  %v2682_v60 = vmul.f32 -1.442695, %v2338_v3 }
 0x502   : > { %3055 = vrcp.f32 %v2396_v2 }
 0x503   : > { %3057 = vpow2.f32 %v2682_v60 }
 0x506   : > { %v3044_v52 = vpop.eup %3043 }
 0x507   : > { %2446 = vst.msk [vmem:[%s3779_s16 + $0x50] sm:$0xff] %vm2435_vm2, %v3044_v52 }
 0x508   : > { %v3046_v53 = vpop.eup %3045 }
 0x509   : > { %v2399_v61 = vadd.f32 1.0, %v3046_v53 }
 0x50a   : > { %v3048_v62 = vpop.eup %3047 }
 0x50b   : > { %2447 = vst.msk [vmem:[%s3779_s16 + $0x58] sm:$0xff] %vm2435_vm2, %v3048_v62  ;;  %3059 = vrcp.f32 %v2399_v61 }
 0x50c   : > { %v3050_v63 = vpop.eup %3049 }
 0x50d   : > { %v3052_v41 = vpop.eup %3051  ;;  %2444 = vst.msk [vmem:[%s3779_s16 + $0x40] sm:$0xff] %vm2435_vm2, %v3050_v63 }
 0x50e   : > { %v3054_v0 = vpop.eup %3053  ;;  %v2400_v5 = vadd.f32 1.0, %v3052_v41 }
 0x50f   : > { %v3056_v6 = vpop.eup %3055  ;;  %v2401_v7 = vadd.f32 1.0, %v3054_v0 }
 0x510   : > { %v3058_v8 = vpop.eup %3057  ;;  %2445 = vst.msk [vmem:[%s3779_s16 + $0x48] sm:$0xff] %vm2435_vm2, %v3056_v6  ;;  %3061 = vrcp.f32 %v2400_v5 }
 0x511   : > { %3063 = vrcp.f32 %v2401_v7  ;;  %v2402_v9 = vadd.f32 1.0, %v3058_v8 }
 0x513   : > { %3065 = vrcp.f32 %v2402_v9 }
 0x518   : > { %v3060_v10 = vpop.eup %3059 }
 0x519   : > { %2448 = vst.msk [vmem:[%s3779_s16 + $0x60] sm:$0xff] %vm2435_vm2, %v3060_v10 }
 0x51d   : > { %v3062_v11 = vpop.eup %3061 }
 0x51e   : > { %v3064_v12 = vpop.eup %3063  ;;  %2449 = vst.msk [vmem:[%s3779_s16 + $0x68] sm:$0xff] %vm2435_vm2, %v3062_v11 }
 0x51f   : > { %2450 = vst.msk [vmem:[%s3779_s16 + $0x70] sm:$0xff] %vm2435_vm2, %v3064_v12 }
 0x520   : > { %v3066_v13 = vpop.eup %3065 }
 0x521   : > { %2451 = vst.msk [vmem:[%s3779_s16 + $0x78] sm:$0xff] %vm2435_vm2, %v3066_v13 }
 0x522 PF: > { %s26_s27 = sadd.s32 1, %s3103_s27  }
 0x523   : > { %p23_p1 = scmp.ge.s32.totalorder %s26_s27, 5  }
 0x525   :  { %25 = sbr.rel (!%p23_p1) target bundleno = 4 (0x4), region = 107 }
 0x52a   :  { %2474 = vsyncpa [#allocation4], 1 }
 0x52b   :  { %2476 = vsyncpa [#allocation4 + $0x1], 1 }

</bundles_post_ra>
